<compile_context>
chip_gen: v7x
topology: tpu7x:2x2x1
jax: 0.10.0
libtpu: 0.0.40
codegen_flags: <defaults>
</compile_context>

<pallas_src>
import functools

import jax
import jax.numpy as jnp
from jax.experimental import pallas as pl
from jax.experimental.pallas import tpu as pltpu


def _round_up(x, m):
    return (x + m - 1) // m * m


def _aspp_kernel(x_ref, w_ref, scale_ref, bias_ref, out_ref, *,
                 h_tile, wo, kh_taps, kw_taps, dilation, cin_pad, im2col):
    """One (batch, h-tile, cout-tile) grid step.

    x_ref    : (Hp, Wp, cin_pad)           padded NHWC input (resident per batch)
    w_ref    : (KH*KW*cin_pad, cout_tile)  weights with taps folded into rows
    scale_ref: (1, cout_tile)              folded BN scale (f32)
    bias_ref : (1, cout_tile)              folded BN bias  (f32)
    out_ref  : (h_tile, wo, cout_tile)     lane-dense output tile
    """
    cout_tile = out_ref.shape[-1]
    h0 = pl.multiple_of(pl.program_id(1) * h_tile, h_tile)

    if im2col:
        # Small Cin: fold all KH*KW taps into the contraction dim so the MXU
        # sees ONE (h_tile*wo, KH*KW*cin_pad) x (KH*KW*cin_pad, cout_tile)
        # matmul instead of KH*KW tiny lane-sparse ones.
        taps = []
        for kh in range(kh_taps):
            for kw in range(kw_taps):
                taps.append(x_ref[pl.ds(h0 + kh * dilation, h_tile),
                                  pl.ds(kw * dilation, wo), :])
        patch = jnp.concatenate(taps, axis=-1)        # (h_tile, wo, KH*KW*cin_pad)
        acc = jnp.dot(patch.reshape(h_tile * wo, patch.shape[-1]), w_ref[...],
                      preferred_element_type=jnp.float32)
    else:
        # Large Cin: per-tap matmuls already saturate the MXU contraction dim.
        # TODO(synk): for very large Cin add a Cin-reduction grid axis with a
        #             VMEM scratch accumulator (pl.when init/finalize).
        acc = jnp.zeros((h_tile * wo, cout_tile), jnp.float32)
        for kh in range(kh_taps):
            for kw in range(kw_taps):
                tap = x_ref[pl.ds(h0 + kh * dilation, h_tile),
                            pl.ds(kw * dilation, wo), :]
                w_tap = w_ref[(kh * kw_taps + kw) * cin_pad:
                              (kh * kw_taps + kw + 1) * cin_pad, :]
                acc += jnp.dot(tap.reshape(h_tile * wo, cin_pad), w_tap,
                               preferred_element_type=jnp.float32)

    y = acc * scale_ref[...] + bias_ref[...]           # fused BN (eval), f32 epilogue
    y = jnp.maximum(y, 0.0)                            # ReLU
    out_ref[...] = y.reshape(h_tile, wo, cout_tile).astype(out_ref.dtype)


def aspp_module_forward(x_nchw, weight_oihw, gamma, beta, running_mean,
                        running_var, *, padding, dilation, eps=1e-5,
                        compute_dtype=jnp.bfloat16, cout_tile=128):
    """Pallas implementation of _ASPPModule.forward (BN in eval mode).

    compute_dtype: activation/weight dtype fed to the MXU (f32 accumulation).
    cout_tile    : output-channel tile; 128 works on all chips, 256 is a good
                   choice on v6e/v7x once Cout >= 256.
    """
    N, Cin, H, W = x_nchw.shape
    Cout, Cin_w, KH, KW = weight_oihw.shape
    assert Cin == Cin_w

    # Output spatial size (stride=1): H + 2p - dilation*(K-1)
    Ho = H + 2 * padding - dilation * (KH - 1)
    Wo = W + 2 * padding - dilation * (KW - 1)

    # ---- tiling choices -------------------------------------------------
    cin_pad = _round_up(Cin, 8)                     # sublane-friendly contraction
    cout_pad = _round_up(Cout, cout_tile)           # lane-dense (128k) output
    n_cout = cout_pad // cout_tile
    h_tile = min(_round_up(Ho, 8), 64)              # spatial tiling (rows)
    n_h = pl.cdiv(Ho, h_tile)
    ho_pad = n_h * h_tile

    # Padded input extents needed by the kernel (halo = dilation*(K-1)).
    Hp = ho_pad + dilation * (KH - 1)
    Wp = Wo + dilation * (KW - 1)                   # == W + 2*padding

    # ---- glue (plain JAX): layout + zero padding + BN folding -----------
    x_nhwc = jnp.transpose(x_nchw, (0, 2, 3, 1))    # NCHW -> NHWC
    x_pad = jnp.pad(
        x_nhwc,
        ((0, 0),
         (padding, Hp - (H + padding)),
         (padding, Wp - (W + padding)),
         (0, cin_pad - Cin))).astype(compute_dtype)

    w_hwio = jnp.transpose(weight_oihw, (2, 3, 1, 0))          # (KH,KW,Cin,Cout)
    w_hwio = jnp.pad(w_hwio, ((0, 0), (0, 0),
                              (0, cin_pad - Cin), (0, cout_pad - Cout)))
    w2d = w_hwio.reshape(KH * KW * cin_pad, cout_pad).astype(compute_dtype)

    scale = (gamma / jnp.sqrt(running_var + eps)).astype(jnp.float32)
    bias = (beta - running_mean * scale).astype(jnp.float32)
    scale = jnp.pad(scale, (0, cout_pad - Cout)).reshape(1, cout_pad)
    bias = jnp.pad(bias, (0, cout_pad - Cout)).reshape(1, cout_pad)

    im2col = cin_pad < 128
    kernel = functools.partial(
        _aspp_kernel, h_tile=h_tile, wo=Wo, kh_taps=KH, kw_taps=KW,
        dilation=dilation, cin_pad=cin_pad, im2col=im2col)

    out_nhwc = pl.pallas_call(
        kernel,
        out_shape=jax.ShapeDtypeStruct((N, ho_pad, Wo, cout_pad), x_nchw.dtype),
        grid_spec=pltpu.PrefetchScalarGridSpec(
            num_scalar_prefetch=0,
            grid=(N, n_h, n_cout),
            in_specs=[
                # Whole padded image stays resident across h/cout tiles.
                pl.BlockSpec((None, Hp, Wp, cin_pad),
                             lambda n, h, j: (n, 0, 0, 0)),
                pl.BlockSpec((KH * KW * cin_pad, cout_tile),
                             lambda n, h, j: (0, j)),
                pl.BlockSpec((1, cout_tile), lambda n, h, j: (0, j)),
                pl.BlockSpec((1, cout_tile), lambda n, h, j: (0, j)),
            ],
            out_specs=pl.BlockSpec((None, h_tile, Wo, cout_tile),
                                   lambda n, h, j: (n, h, 0, j)),
        ),
        compiler_params=pltpu.CompilerParams(
            dimension_semantics=("parallel", "parallel", "parallel"),
            vmem_limit_bytes=32 * 1024 * 1024),
    )(x_pad, w2d, scale, bias)

    out_nhwc = out_nhwc[:, :Ho, :, :Cout]           # drop row / channel padding
    return jnp.transpose(out_nhwc, (0, 3, 1, 2))    # NHWC -> NCHW


def _reference(x_nchw, weight_oihw, gamma, beta, running_mean, running_var,
               *, padding, dilation, eps=1e-5, compute_dtype=jnp.bfloat16):
    """Plain-JAX reference (matches PyTorch eval-mode forward; same dtypes)."""
    y = jax.lax.conv_general_dilated(
        x_nchw.astype(compute_dtype), weight_oihw.astype(compute_dtype),
        window_strides=(1, 1),
        padding=((padding, padding), (padding, padding)),
        rhs_dilation=(dilation, dilation),
        dimension_numbers=("NCHW", "OIHW", "NCHW"),
        preferred_element_type=jnp.float32)
    inv = 1.0 / jnp.sqrt(running_var + eps)
    y = (y - running_mean[None, :, None, None]) * inv[None, :, None, None]
    y = y * gamma[None, :, None, None] + beta[None, :, None, None]
    return jnp.maximum(y, 0.0).astype(x_nchw.dtype)


if __name__ == "__main__":
    # _ASPPModule(inplanes=4, planes=8, kernel_size=3, padding=2, dilation=2)
    N, Cin, H, W = 2, 4, 16, 16
    Cout, K, padding, dilation = 8, 3, 2, 2

    key = jax.random.PRNGKey(0)
    kx, kw, kg, kb, km, kv = jax.random.split(key, 6)

    x = jax.random.normal(kx, (N, Cin, H, W), dtype=jnp.float32)
    weight = jax.random.normal(kw, (Cout, Cin, K, K), dtype=jnp.float32) * 0.1
    gamma = 1.0 + 0.1 * jax.random.normal(kg, (Cout,), dtype=jnp.float32)
    beta = 0.1 * jax.random.normal(kb, (Cout,), dtype=jnp.float32)
    running_mean = 0.1 * jax.random.normal(km, (Cout,), dtype=jnp.float32)
    running_var = jnp.abs(1.0 + 0.1 * jax.random.normal(kv, (Cout,),
                                                        dtype=jnp.float32))

    out = aspp_module_forward(x, weight, gamma, beta, running_mean,
                              running_var, padding=padding, dilation=dilation)
    out = jax.block_until_ready(out)

    ref = _reference(x, weight, gamma, beta, running_mean, running_var,
                     padding=padding, dilation=dilation)
    assert out.shape == (N, Cout, H, W), out.shape
    # bf16 inputs with f32 accumulation in both paths -> differences are only
    # summation-order level; 2e-3 leaves ample margin.
    assert jnp.allclose(out, ref, atol=2e-3, rtol=2e-3), "mismatch vs reference"

    print("KERNEL_OK")
</pallas_src>

<mosaic_0001>
module attributes {stable_mosaic.version = 11 : i64} {
  func.func @_aspp_kernel(%arg0: i32, %arg1: i32, %arg2: i32, %arg3: memref<1x20x20x8xbf16, #tpu.memory_space<vmem>>, %arg4: memref<72x128xbf16, #tpu.memory_space<vmem>>, %arg5: memref<1x128xf32, #tpu.memory_space<vmem>>, %arg6: memref<1x128xf32, #tpu.memory_space<vmem>>, %arg7: memref<1x16x16x128xf32, #tpu.memory_space<vmem>>) attributes {dimension_semantics = [#tpu.dimension_semantics<parallel>, #tpu.dimension_semantics<parallel>, #tpu.dimension_semantics<parallel>], iteration_bounds = array<i64: 2, 1, 1>, scalar_prefetch = 0 : i64, scratch_operands = 0 : i64, tpu.core_type = #tpu.core_type<tc>, window_params = [{transform_indices = @transform_0, window_bounds = array<i64: 1, 20, 20, 8>}, {transform_indices = @transform_1, window_bounds = array<i64: 72, 128>}, {transform_indices = @transform_2, window_bounds = array<i64: 1, 128>}, {transform_indices = @transform_3, window_bounds = array<i64: 1, 128>}, {transform_indices = @transform_4, window_bounds = array<i64: 1, 16, 16, 128>}]} {
    %c16_i32 = arith.constant 16 : i32
    %0 = arith.muli %arg1, %c16_i32 : i32
    %1 = tpu.assume_multiple %0, 16 : i32
    %c0_i32 = arith.constant 0 : i32
    %2 = arith.addi %1, %c0_i32 : i32
    %c0 = arith.constant 0 : index
    %3 = arith.index_cast %2 : i32 to index
    %c0_0 = arith.constant 0 : index
    %c0_1 = arith.constant 0 : index
    %4 = vector.load %arg3[%c0, %3, %c0_0, %c0_1] : memref<1x20x20x8xbf16, #tpu.memory_space<vmem>>, vector<1x16x16x8xbf16>
    %5 = vector.shape_cast %4 : vector<1x16x16x8xbf16> to vector<16x16x8xbf16>
    %c0_i32_2 = arith.constant 0 : i32
    %6 = arith.addi %1, %c0_i32_2 : i32
    %c0_3 = arith.constant 0 : index
    %7 = arith.index_cast %6 : i32 to index
    %c2 = arith.constant 2 : index
    %c0_4 = arith.constant 0 : index
    %8 = vector.load %arg3[%c0_3, %7, %c2, %c0_4] : memref<1x20x20x8xbf16, #tpu.memory_space<vmem>>, vector<1x16x16x8xbf16>
    %9 = vector.shape_cast %8 : vector<1x16x16x8xbf16> to vector<16x16x8xbf16>
    %c0_i32_5 = arith.constant 0 : i32
    %10 = arith.addi %1, %c0_i32_5 : i32
    %c0_6 = arith.constant 0 : index
    %11 = arith.index_cast %10 : i32 to index
    %c4 = arith.constant 4 : index
    %c0_7 = arith.constant 0 : index
    %12 = vector.load %arg3[%c0_6, %11, %c4, %c0_7] : memref<1x20x20x8xbf16, #tpu.memory_space<vmem>>, vector<1x16x16x8xbf16>
    %13 = vector.shape_cast %12 : vector<1x16x16x8xbf16> to vector<16x16x8xbf16>
    %c2_i32 = arith.constant 2 : i32
    %14 = arith.addi %1, %c2_i32 : i32
    %c0_8 = arith.constant 0 : index
    %15 = arith.index_cast %14 : i32 to index
    %c0_9 = arith.constant 0 : index
    %c0_10 = arith.constant 0 : index
    %16 = vector.load %arg3[%c0_8, %15, %c0_9, %c0_10] : memref<1x20x20x8xbf16, #tpu.memory_space<vmem>>, vector<1x16x16x8xbf16>
    %17 = vector.shape_cast %16 : vector<1x16x16x8xbf16> to vector<16x16x8xbf16>
    %c2_i32_11 = arith.constant 2 : i32
    %18 = arith.addi %1, %c2_i32_11 : i32
    %c0_12 = arith.constant 0 : index
    %19 = arith.index_cast %18 : i32 to index
    %c2_13 = arith.constant 2 : index
    %c0_14 = arith.constant 0 : index
    %20 = vector.load %arg3[%c0_12, %19, %c2_13, %c0_14] : memref<1x20x20x8xbf16, #tpu.memory_space<vmem>>, vector<1x16x16x8xbf16>
    %21 = vector.shape_cast %20 : vector<1x16x16x8xbf16> to vector<16x16x8xbf16>
    %c2_i32_15 = arith.constant 2 : i32
    %22 = arith.addi %1, %c2_i32_15 : i32
    %c0_16 = arith.constant 0 : index
    %23 = arith.index_cast %22 : i32 to index
    %c4_17 = arith.constant 4 : index
    %c0_18 = arith.constant 0 : index
    %24 = vector.load %arg3[%c0_16, %23, %c4_17, %c0_18] : memref<1x20x20x8xbf16, #tpu.memory_space<vmem>>, vector<1x16x16x8xbf16>
    %25 = vector.shape_cast %24 : vector<1x16x16x8xbf16> to vector<16x16x8xbf16>
    %c4_i32 = arith.constant 4 : i32
    %26 = arith.addi %1, %c4_i32 : i32
    %c0_19 = arith.constant 0 : index
    %27 = arith.index_cast %26 : i32 to index
    %c0_20 = arith.constant 0 : index
    %c0_21 = arith.constant 0 : index
    %28 = vector.load %arg3[%c0_19, %27, %c0_20, %c0_21] : memref<1x20x20x8xbf16, #tpu.memory_space<vmem>>, vector<1x16x16x8xbf16>
    %29 = vector.shape_cast %28 : vector<1x16x16x8xbf16> to vector<16x16x8xbf16>
    %c4_i32_22 = arith.constant 4 : i32
    %30 = arith.addi %1, %c4_i32_22 : i32
    %c0_23 = arith.constant 0 : index
    %31 = arith.index_cast %30 : i32 to index
    %c2_24 = arith.constant 2 : index
    %c0_25 = arith.constant 0 : index
    %32 = vector.load %arg3[%c0_23, %31, %c2_24, %c0_25] : memref<1x20x20x8xbf16, #tpu.memory_space<vmem>>, vector<1x16x16x8xbf16>
    %33 = vector.shape_cast %32 : vector<1x16x16x8xbf16> to vector<16x16x8xbf16>
    %c4_i32_26 = arith.constant 4 : i32
    %34 = arith.addi %1, %c4_i32_26 : i32
    %c0_27 = arith.constant 0 : index
    %35 = arith.index_cast %34 : i32 to index
    %c4_28 = arith.constant 4 : index
    %c0_29 = arith.constant 0 : index
    %36 = vector.load %arg3[%c0_27, %35, %c4_28, %c0_29] : memref<1x20x20x8xbf16, #tpu.memory_space<vmem>>, vector<1x16x16x8xbf16>
    %37 = vector.shape_cast %36 : vector<1x16x16x8xbf16> to vector<16x16x8xbf16>
    %38 = tpu.concatenate %5, %9, %13, %17, %21, %25, %29, %33, %37 in 2 : vector<16x16x8xbf16>, vector<16x16x8xbf16>, vector<16x16x8xbf16>, vector<16x16x8xbf16>, vector<16x16x8xbf16>, vector<16x16x8xbf16>, vector<16x16x8xbf16>, vector<16x16x8xbf16>, vector<16x16x8xbf16> -> vector<16x16x72xbf16>
    %39 = vector.shape_cast %38 : vector<16x16x72xbf16> to vector<256x72xbf16>
    %c0_30 = arith.constant 0 : index
    %c0_31 = arith.constant 0 : index
    %40 = vector.load %arg4[%c0_30, %c0_31] : memref<72x128xbf16, #tpu.memory_space<vmem>>, vector<72x128xbf16>
    %cst = arith.constant dense<0.000000e+00> : vector<256x128xf32>
    %41 = tpu.matmul %39, %40, %cst {dimension_numbers = #tpu.dot_dimension_numbers<[1], [0], [0], [1], [0, 0, 1, 1], [], []>} : vector<256x72xbf16>, vector<72x128xbf16>, vector<256x128xf32> -> vector<256x128xf32>
    %c0_32 = arith.constant 0 : index
    %c0_33 = arith.constant 0 : index
    %42 = vector.load %arg5[%c0_32, %c0_33] : memref<1x128xf32, #tpu.memory_space<vmem>>, vector<1x128xf32>
    %43 = vector.broadcast %42 : vector<1x128xf32> to vector<256x128xf32>
    %44 = arith.mulf %41, %43 : vector<256x128xf32>
    %c0_34 = arith.constant 0 : index
    %c0_35 = arith.constant 0 : index
    %45 = vector.load %arg6[%c0_34, %c0_35] : memref<1x128xf32, #tpu.memory_space<vmem>>, vector<1x128xf32>
    %46 = vector.broadcast %45 : vector<1x128xf32> to vector<256x128xf32>
    %47 = arith.addf %44, %46 : vector<256x128xf32>
    %cst_36 = arith.constant 0.000000e+00 : f32
    %48 = vector.broadcast %cst_36 : f32 to vector<256x128xf32>
    %49 = arith.maximumf %47, %48 : vector<256x128xf32>
    %50 = vector.shape_cast %49 : vector<256x128xf32> to vector<16x16x128xf32>
    %c0_37 = arith.constant 0 : index
    %c0_38 = arith.constant 0 : index
    %c0_39 = arith.constant 0 : index
    %c0_40 = arith.constant 0 : index
    %51 = vector.load %arg7[%c0_37, %c0_38, %c0_39, %c0_40] : memref<1x16x16x128xf32, #tpu.memory_space<vmem>>, vector<1x16x16x128xf32>
    %52 = vector.shape_cast %51 : vector<1x16x16x128xf32> to vector<16x16x128xf32>
    %53 = vector.shape_cast %50 : vector<16x16x128xf32> to vector<1x16x16x128xf32>
    tpu.vector_store %arg7[%c0_37, %c0_38, %c0_39, %c0_40], %53 {strides = array<i32>} : memref<1x16x16x128xf32, #tpu.memory_space<vmem>>, vector<1x16x16x128xf32>,
    return
  }
  func.func @transform_0(%arg0: i32, %arg1: i32, %arg2: i32) -> (i32, i32, i32, i32) {
    %c0_i32 = arith.constant 0 : i32
    %c0_i32_0 = arith.constant 0 : i32
    %c0_i32_1 = arith.constant 0 : i32
    %c0_i32_2 = arith.constant 0 : i32
    return %arg0, %c0_i32, %c0_i32_0, %c0_i32_1 : i32, i32, i32, i32
  }
  func.func @transform_1(%arg0: i32, %arg1: i32, %arg2: i32) -> (i32, i32) {
    %c0_i32 = arith.constant 0 : i32
    %c0_i32_0 = arith.constant 0 : i32
    return %c0_i32, %arg2 : i32, i32
  }
  func.func @transform_2(%arg0: i32, %arg1: i32, %arg2: i32) -> (i32, i32) {
    %c0_i32 = arith.constant 0 : i32
    %c0_i32_0 = arith.constant 0 : i32
    return %c0_i32, %arg2 : i32, i32
  }
  func.func @transform_3(%arg0: i32, %arg1: i32, %arg2: i32) -> (i32, i32) {
    %c0_i32 = arith.constant 0 : i32
    %c0_i32_0 = arith.constant 0 : i32
    return %c0_i32, %arg2 : i32, i32
  }
  func.func @transform_4(%arg0: i32, %arg1: i32, %arg2: i32) -> (i32, i32, i32, i32) {
    %c0_i32 = arith.constant 0 : i32
    %c0_i32_0 = arith.constant 0 : i32
    return %arg0, %arg1, %c0_i32, %arg2 : i32, i32, i32, i32
  }
}

</mosaic_0001>

<bundles_post_ra>
// kernel: tpu_custom_call.1
= control target key start
LH: loop header
LB: loop body
LE: loop exit
PB: predicated region body
PF: predicated region fallthrough
CT: control target
= control target key end

     0   :  { %9 = vsyncpa [#allocation3], 0  ;;  %s4925_s0 = inlined_call_operand.vmem [shape: bf16[2,20,20,8], index: 0, kind: input, shape index: {}]   ;;  %s4926_s1 = inlined_call_operand.vmem [shape: bf16[72,128], index: 1, kind: input, shape index: {}]   ;;  %s4927_s2 = inlined_call_operand.vmem [shape: f32[1,128], index: 2, kind: input, shape index: {}]   ;;  %s4928_s3 = inlined_call_operand.vmem [shape: f32[1,128], index: 3, kind: input, shape index: {}]   ;;  %s4929_s4 = inlined_call_operand.hbm [shape: f32[2,16,16,128], index: 4, kind: output, shape index: {}]  }
   0x1   :  { %11 = vsyncpa [#allocation3 + $0x1], 0  ;;  %s3711_s15 = smov 0   ;;  %s3713_s16 = smov 0  }
   0x2   :  { %s3715_s17 = smov 0   ;;  %s3717_s18 = smov 0  }
   0x3   :  { %s3719_s19 = smov 0   ;;  %s3721_s20 = smov 0  }
   0x4 LB: > { %s2728_s21 = sadd.s32 4294967295, %s3674_s20   ;;  %s2729_s22 = sadd.s32 4294967294, %s3674_s20   ;;  %s3674_s20 = sphi %s3721_s20, %s17_s20   ;;  %s3670_s19 = sphi %s3719_s19, %s4936_s19   ;;  %s3666_s18 = sphi %s3717_s18, %s4935_s18   ;;  %s3662_s17 = sphi %s3715_s17, %s4934_s17   ;;  %s3658_s16 = sphi %s3713_s16, %s4933_s16   ;;  %s3654_s15 = sphi %s3711_s15, %s4932_s15  }
   0x5   : > { %s36_s23 = sadd.s32 1, %s3670_s19  ;;  %s151_s24 = sadd.s32 1, %s3662_s17 }
   0x6   : > { %p38_p0 = scmp.ge.s32.totalorder %s36_s23, 2  ;;  %p161_p1 = scmp.ne.s32.totalorder %s3662_s17, %s3658_s16 }
   0x7   : > { %p162_p2 = scmp.eq.s32.totalorder %s2728_s21, 1  ;;  %p167_p3 = scmp.ne.s32.totalorder %s3658_s16, %s3654_s15 }
   0x8   : > { %s4938_s23 = smov (%p38_p0, %s36_s23), 0  ;;  %p168_p5 = scmp.eq.s32.totalorder %s2729_s22, 1 }
   0x9   : > { %p3751_p4 = por %p162_p2, %p161_p1  ;;  %s144_s26 = ssub.s32 %s3670_s19, %s4938_s23 }
   0xa   : > { %p2735_p6 = scmp.ge.s32.totalorder %s3674_s20, 1  ;;  %p149_p7 = scmp.eq.s32.totalorder %s144_s26, 0 }
   0xb   : > { %p3758_p8 = por %p168_p5, %p167_p3  ;;  %p213_p9 = scmp.lt.s32.totalorder %s3674_s20, 3 }
   0xc   : > { %s3764_s28 = scalar_select %p149_p7, %s3662_s17, %s151_s24  }
   0xd   : > { %p214_p10 = pnand %p2735_p6, %p213_p9 }
   0xe   : > { %p249_p11 = scmp.lt.s32.totalorder (!%p214_p10), %s3666_s18, 1  ;;  %vm742_vm0 = vcmask (!%p214_p10), 1046528   ;;  %s3676_s8 = smov (!%p214_p10), 8   ;;  %vm919_vm1 = vcmask (!%p214_p10), 1045504   ;;  %vm2277_vm2 = vcmask (!%p214_p10), 1043456   ;;  %vm1928_vm3 = vcmask (!%p214_p10), 64512  }
   0xf   : > { %217 = sbr.rel (%p214_p10) target bundleno = 638 (0x27e), region = 36  ;;  %s3677_s9 = smov (!%p214_p10), 16   ;;  %vm1977_vm4 = vcmask (!%p214_p10), 130048   ;;  %vm2010_vm5 = vcmask (!%p214_p10), 195584   ;;  %vm2043_vm6 = vcmask (!%p214_p10), 261120   ;;  %vm2076_vm7 = vcmask (!%p214_p10), 326656  }
  0x10   : > { %s3678_s10 = smov (!%p214_p10), 24   ;;  %s3679_s11 = smov (!%p214_p10), 32   ;;  %vm2109_vm8 = vcmask (!%p214_p10), 392192   ;;  %vm2142_vm9 = vcmask (!%p214_p10), 457728   ;;  %vm2175_vm10 = vcmask (!%p214_p10), 523264   ;;  %vm2244_vm11 = vcmask (!%p214_p10), 588800  }
  0x11   : > { %s3680_s12 = smov (!%p214_p10), 40   ;;  %s3681_s24 = smov (!%p214_p10), 48  }
  0x12   : > { %s3682_s6 = smov (!%p214_p10), 56   ;;  %s3683_s13 = smov (!%p214_p10), 64  }
  0x13   : > { %s3198_s26 = sshll.u32 (!%p214_p10), %s3666_s18, 12  ;;  %s3684_s14 = smov (!%p214_p10), [#allocation2]  }
  0x14   : > { %s4868_s5 = scalar_lea.hbm (!%p214_p10), %s4929_s4, %s3198_s26  ;;  %s3600_s21 = sshll.u32 (!%p214_p10), %s3684_s14, 4  ;;  %s3601_s21 = int_to_ptr.vmem [resolvable:$false] %s3600_s21 }
  0x16   : > { %s250_s29 = scalar_select %p249_p11, %s3666_s18, 1 }
  0x18   : > { %s3274_s30 = smul.u32 240, %s250_s29 }
  0x1a   : > { %s3771_s7 = scalar_lea.vmem %s4925_s0, %s3274_s30 }
  0x1b   : > { %v273_v0 = vld [vmem:[%s3771_s7 + $0x10] sm:$0xf]  ;;  %v304_v1 = vld [vmem:[%s3771_s7 + $0xc] sm:$0xe]  ;;  %v271_v4 = vld [vmem:[%s3771_s7 + $0x4] sm:$0xf] }
  0x1c   : > { %v2948_v2 = vcombine.low %v304_v1, %v273_v0  ;;  %v3340_v3 = vld [vmem:[%s3771_s7 + $0x14] ss:$0 sps:$4 sm:$0x11]   ;;  %v302_v5 = vld [vmem:[%s3771_s7] sm:$0xe] }
  0x1d   : > { %v289_v6 = vld [vmem:[%s3771_s7 + $0x70] sm:$0xf]  ;;  %v747_v8 = vrot.slane %v3340_v3, 1  ;;  %v2946_v9 = vcombine.low %v302_v5, %v271_v4  ;;  %v3342_v10 = vld [vmem:[%s3771_s7 + $0x8] ss:$0 sps:$4 sm:$0x11]  }
  0x1e   : > { %v746_v7 = vrot.slane %v2948_v2, 1  ;;  %v320_v11 = vld [vmem:[%s3771_s7 + $0x6c] sm:$0xe]  ;;  %v287_v12 = vld [vmem:[%s3771_s7 + $0x64] sm:$0xf]  ;;  %v744_v15 = vrot.slane %v3342_v10, 1 }
  0x1f   : > { %v743_v14 = vrot.slane %v2946_v9, 1  ;;  %v2964_v16 = vcombine.low %v320_v11, %v289_v6  ;;  %v3344_v17 = vld [vmem:[%s3771_s7 + $0x74] ss:$0 sps:$4 sm:$0x11]   ;;  %v318_v18 = vld [vmem:[%s3771_s7 + $0x60] sm:$0xe] }
  0x20   : > { %v748_v13 = vsel %vm742_vm0, %v746_v7, %v747_v8  ;;  %v350_v19 = vld [vmem:[%s3771_s7 + $0x60] sm:$0xc]  ;;  %v771_v22 = vrot.slane %v3344_v17, 1  ;;  %v2962_v23 = vcombine.low %v318_v18, %v287_v12  ;;  %v3346_v24 = vld [vmem:[%s3771_s7 + $0x68] ss:$0 sps:$4 sm:$0x11]  }
  0x21   : > { %793 = vrot.lane.b32.xlu1 %v748_v13, %s3676_s8  ;;  %v745_v20 = vsel %vm742_vm0, %v743_v14, %v744_v15  ;;  %v770_v21 = vrot.slane %v2964_v16, 1  ;;  %v2994_v25 = vcombine.low %v350_v19, %v287_v12  ;;  %v3348_v26 = vld [vmem:[%s3771_s7 + $0x68] ss:$0 sps:$4 sm:$0x33]   ;;  %v768_v29 = vrot.slane %v3346_v24, 1 }
  0x22   : > { %791 = vrot.lane.b32.xlu0 %v745_v20, %s3676_s8  ;;  %v767_v28 = vrot.slane %v2962_v23, 1  ;;  %v334_v30 = vld [vmem:[%s3771_s7] sm:$0xc]  ;;  %v945_v32 = vrot.slane %v3348_v26, 2  ;;  %v352_v36 = vld [vmem:[%s3771_s7 + $0x6c] sm:$0xc] }
  0x23   : > { %v772_v27 = vsel %vm742_vm0, %v770_v21, %v771_v22  ;;  %v944_v31 = vrot.slane %v2994_v25, 2  ;;  %v2978_v33 = vcombine.low %v334_v30, %v271_v4  ;;  %v3350_v34 = vld [vmem:[%s3771_s7 + $0x8] ss:$0 sps:$4 sm:$0x33]   ;;  %v336_v37 = vld [vmem:[%s3771_s7 + $0xc] sm:$0xc]  ;;  %v2996_v41 = vcombine.low %v352_v36, %v289_v6 }
  0x24   : > { %v769_v35 = vsel %vm742_vm0, %v767_v28, %v768_v29  ;;  %v921_v40 = vrot.slane %v3350_v34, 2  ;;  %v3352_v42 = vld [vmem:[%s3771_s7 + $0x74] ss:$0 sps:$4 sm:$0x33]   ;;  %v2980_v43 = vcombine.low %v336_v37, %v273_v0  ;;  %v2754_v50 = vld [vmem:[%s3771_s7 + $0x78] sm:$0xf] }
  0x25   : > { %809 = vrot.lane.b32.xlu1 %v772_v27, %s3676_s8  ;;  %v946_v38 = vsel %vm919_vm1, %v944_v31, %v945_v32  ;;  %v920_v39 = vrot.slane %v2978_v33, 2  ;;  %v3354_v44 = vld [vmem:[%s3771_s7 + $0x14] ss:$0 sps:$4 sm:$0x33]   ;;  %v947_v46 = vrot.slane %v2996_v41, 2  ;;  %v948_v47 = vrot.slane %v3352_v42, 2 }
  0x26   : > { %807 = vrot.lane.b32.xlu0 %v769_v35, %s3676_s8  ;;  %v923_v48 = vrot.slane %v2980_v43, 2  ;;  %v924_v49 = vrot.slane %v3354_v44, 2  ;;  %v2755_v51 = vld [vmem:[%s3771_s7 + $0x7c] sm:$0xf]  ;;  %v2738_v53 = vld [vmem:[%s3771_s7 + $0x18] sm:$0xf] }
  0x27   : > { %v922_v45 = vsel %vm919_vm1, %v920_v39, %v921_v40  ;;  %v949_v52 = vsel %vm919_vm1, %v947_v46, %v948_v47  ;;  %v2739_v55 = vld [vmem:[%s3771_s7 + $0x1c] sm:$0xf]  ;;  %v2786_v56 = vld [vmem:[%s3771_s7 + $0x78] sm:$0xe]  ;;  %v3018_v57 = vcombine.low %v2754_v50, %v2755_v51  ;;  %v2756_v58 = vld [vmem:[%s3771_s7 + $0x84] sm:$0xf] }
  0x28   : > { %v925_v54 = vsel %vm919_vm1, %v923_v48, %v924_v49  ;;  %v2757_v59 = vld [vmem:[%s3771_s7 + $0x88] sm:$0xf]  ;;  %v3042_v60 = vcombine.low %v2786_v56, %v2755_v51  ;;  %v2770_v61 = vld [vmem:[%s3771_s7 + $0x18] sm:$0xe]  ;;  %v3010_v63 = vcombine.low %v2738_v53, %v2739_v55  ;;  %v2740_v0 = vld [vmem:[%s3771_s7 + $0x24] sm:$0xf] }
  0x29   : > { %984 = vrot.lane.b32.xlu1 %v946_v38, %s3677_s9  ;;  %v3360_v62 = vld [vmem:[%s3771_s7 + $0x80] ss:$0 sps:$4 sm:$0x11]   ;;  %v2788_v1 = vld [vmem:[%s3771_s7 + $0x84] sm:$0xe]  ;;  %v3026_v3 = vcombine.low %v2770_v61, %v2739_v55  ;;  %v3019_v5 = vcombine.low %v2756_v58, %v2757_v59 }
  0x2a   : > { %968 = vrot.lane.b32.xlu0 %v922_v45, %s3677_s9  ;;  %v2741_v2 = vld [vmem:[%s3771_s7 + $0x28] sm:$0xf]  ;;  %v3362_v4 = vld [vmem:[%s3771_s7 + $0x20] ss:$0 sps:$4 sm:$0x11]   ;;  %v1232_v6 = vrot.slane %v3042_v60, 1  ;;  %v3044_v7 = vcombine.low %v2788_v1, %v2757_v59 }
  0x2b   : > { %v2772_v8 = vld [vmem:[%s3771_s7 + $0x24] sm:$0xe]  ;;  %v1233_v9 = vrot.slane %v3360_v62, 1  ;;  %v3364_v10 = vld [vmem:[%s3771_s7 + $0x8c] ss:$0 sps:$4 sm:$0x11]   ;;  %v3011_v12 = vcombine.low %v2740_v0, %v2741_v2 }
  0x2c   : > { %v2818_v11 = vld [vmem:[%s3771_s7 + $0x78] sm:$0xc]  ;;  %v3028_v13 = vcombine.low %v2772_v8, %v2741_v2  ;;  %v3366_v14 = vld [vmem:[%s3771_s7 + $0x2c] ss:$0 sps:$4 sm:$0x11]   ;;  %v1208_v15 = vrot.slane %v3026_v3, 1 }
  0x2d   : > { %986 = vrot.lane.b32.xlu1 %v949_v52, %s3677_s9  ;;  %v1209_v16 = vrot.slane %v3362_v4, 1  ;;  %v2802_v17 = vld [vmem:[%s3771_s7 + $0x18] sm:$0xc]  ;;  %v1235_v18 = vrot.slane %v3044_v7, 1  ;;  %v1234_v19 = vsel %vm742_vm0, %v1232_v6, %v1233_v9  ;;  %v1236_v20 = vrot.slane %v3364_v10, 1  ;;  %v3483_v50 = vld [vmem:[%s4926_s1] sm:$0xff]  }
  0x2e   : > { %970 = vrot.lane.b32.xlu0 %v925_v54, %s3677_s9  ;;  %v3074_v21 = vcombine.low %v2818_v11, %v2755_v51  ;;  %v3368_v22 = vld [vmem:[%s3771_s7 + $0x80] ss:$0 sps:$4 sm:$0x33]   ;;  %v1211_v23 = vrot.slane %v3028_v13, 1  ;;  %v3058_v24 = vcombine.low %v2802_v17, %v2739_v55  ;;  %v2820_v25 = vld [vmem:[%s3771_s7 + $0x84] sm:$0xc]  ;;  %3220 = vmatprep.subr.bf16.mxu0 %v3483_v50 }
  0x2f   : > { %v1210_v26 = vsel %vm742_vm0, %v1208_v15, %v1209_v16  ;;  %v1212_v27 = vrot.slane %v3366_v14, 1  ;;  %v3370_v28 = vld [vmem:[%s3771_s7 + $0x20] ss:$0 sps:$4 sm:$0x33]   ;;  %v2804_v29 = vld [vmem:[%s3771_s7 + $0x24] sm:$0xc]  ;;  %v1237_v30 = vsel %vm742_vm0, %v1235_v18, %v1236_v20  ;;  %v3076_v33 = vcombine.low %v2820_v25, %v2757_v59  ;;  %3262 = vmatprep.subr.bf16.mxu1 %v3483_v50  ;;  %3221 = vmatpush3.bf16.msra.mxu0 %v3483_v50 }
  0x30   : > { %v1408_v31 = vrot.slane %v3074_v21, 2  ;;  %v1409_v32 = vrot.slane %v3368_v22, 2  ;;  %v3372_v34 = vld [vmem:[%s3771_s7 + $0x8c] ss:$0 sps:$4 sm:$0x33]   ;;  %v1384_v35 = vrot.slane %v3058_v24, 2  ;;  %v3060_v38 = vcombine.low %v2804_v29, %v2741_v2  ;;  %3267 = vmatpush3.bf16.msra.mxu1 %v3483_v50 }
  0x31   : > { %1096 = vrot.lane.b32.xlu1 %v3018_v57, %s3678_s10  ;;  %v1213_v36 = vsel %vm742_vm0, %v1211_v23, %v1212_v27  ;;  %v1385_v37 = vrot.slane %v3370_v28, 2  ;;  %v3374_v39 = vld [vmem:[%s3771_s7 + $0x2c] ss:$0 sps:$4 sm:$0x33]   ;;  %v1411_v41 = vrot.slane %v3076_v33, 2  ;;  %v1412_v42 = vrot.slane %v3372_v34, 2 }
  0x32   : > { %1080 = vrot.lane.b32.xlu0 %v3010_v63, %s3678_s10  ;;  %v1410_v40 = vsel %vm919_vm1, %v1408_v31, %v1409_v32  ;;  %v1387_v44 = vrot.slane %v3060_v38, 2  ;;  %v1388_v45 = vrot.slane %v3374_v39, 2  ;;  %v2850_v46 = vld [vmem:[%s3771_s7 + $0x90] sm:$0xf]  ;;  %v3851_v48 = vld [vmem:[%s3771_s7 + $0x94] sm:$0xf] }
  0x33   : > { %v1386_v43 = vsel %vm919_vm1, %v1384_v35, %v1385_v37  ;;  %v1413_v47 = vsel %vm919_vm1, %v1411_v41, %v1412_v42  ;;  %v2882_v49 = vld [vmem:[%s3771_s7 + $0x90] sm:$0xe]  ;;  %v3861_v53 = vld [vmem:[%s3771_s7 + $0x34] sm:$0xf]  ;;  %v2852_v54 = vld [vmem:[%s3771_s7 + $0x9c] sm:$0xf]  ;;  %v3098_v55 = vcombine.low %v2850_v46, %v3851_v48 }
  0x34   : > { %v2834_v51 = vld [vmem:[%s3771_s7 + $0x30] sm:$0xf]  ;;  %v1389_v52 = vsel %vm919_vm1, %v1387_v44, %v1388_v45  ;;  %v3122_v56 = vcombine.low %v2882_v49, %v3851_v48  ;;  %v3380_v57 = vld [vmem:[%s3771_s7 + $0x98] ss:$0 sps:$4 sm:$0x11]   ;;  %v3488_v59 = vld [vmem:[%s4926_s1 + $0x8] sm:$0xff]  }
  0x35   : > { %1098 = vrot.lane.b32.xlu1 %v3019_v5, %s3678_s10  ;;  %v2866_v58 = vld [vmem:[%s3771_s7 + $0x30] sm:$0xe]  ;;  %v3873_v60 = vld [vmem:[%s3771_s7 + $0xa0] sm:$0xf]  ;;  %v2884_v61 = vld [vmem:[%s3771_s7 + $0x9c] sm:$0xe]  ;;  %v3090_v62 = vcombine.low %v2834_v51, %v3861_v53  ;;  %3222 = vmatprep.subr.bf16.mxu0 %v3488_v59 }
  0x36   : > { %1082 = vrot.lane.b32.xlu0 %v3011_v12, %s3678_s10  ;;  %v2836_v63 = vld [vmem:[%s3771_s7 + $0x3c] sm:$0xf]  ;;  %v3382_v0 = vld [vmem:[%s3771_s7 + $0x38] ss:$0 sps:$4 sm:$0x11]   ;;  %v3106_v2 = vcombine.low %v2866_v58, %v3861_v53  ;;  %3263 = vmatprep.subr.bf16.mxu1 %v3488_v59  ;;  %v3099_v4 = vcombine.low %v2852_v54, %v3873_v60  ;;  %v1696_v5 = vrot.slane %v3122_v56, 1  ;;  %v3124_v6 = vcombine.low %v2884_v61, %v3873_v60 }
  0x37   : > { %v3881_v1 = vld [vmem:[%s3771_s7 + $0x40] sm:$0xf]  ;;  %v2868_v3 = vld [vmem:[%s3771_s7 + $0x3c] sm:$0xe]  ;;  %3223 = vmatpush3.bf16.msra.mxu0 %v3488_v59  ;;  %v3493_v7 = vld [vmem:[%s4926_s1 + $0x10] sm:$0xff]   ;;  %v1697_v8 = vrot.slane %v3380_v57, 1  ;;  %3268 = vmatpush3.bf16.msra.mxu1 %v3488_v59 }
  0x38   : > { %v3384_v9 = vld [vmem:[%s3771_s7 + $0xa4] ss:$0 sps:$4 sm:$0x11]   ;;  %v3091_v10 = vcombine.low %v2836_v63, %v3881_v1  ;;  %v3108_v11 = vcombine.low %v2868_v3, %v3881_v1  ;;  %v2914_v13 = vld [vmem:[%s3771_s7 + $0x90] sm:$0xc]  ;;  %3224 = vmatprep.subr.bf16.mxu0 %v3493_v7  ;;  %v1672_v14 = vrot.slane %v3106_v2, 1  ;;  %3264 = vmatprep.subr.bf16.mxu1 %v3493_v7 }
  0x39   : > { %1272 = vrot.lane.b32.xlu1 %v1234_v19, %s3679_s11  ;;  %v3386_v12 = vld [vmem:[%s3771_s7 + $0x44] ss:$0 sps:$4 sm:$0x11]   ;;  %v1673_v15 = vrot.slane %v3382_v0, 1  ;;  %v2898_v16 = vld [vmem:[%s3771_s7 + $0x30] sm:$0xc]  ;;  %v1698_v20 = vsel %vm742_vm0, %v1696_v5, %v1697_v8  ;;  %v3154_v22 = vcombine.low %v2914_v13, %v3851_v48 }
  0x3a   : > { %1256 = vrot.lane.b32.xlu0 %v1210_v26, %s3679_s11  ;;  %v1699_v17 = vrot.slane %v3124_v6, 1  ;;  %v3900_v18 = vld [vmem:[%s3771_s7 + $0x7c] sm:$0xf]  ;;  %v322_v19 = vld [vmem:[%s3771_s7 + $0x78] sm:$0xe]  ;;  %v1700_v21 = vrot.slane %v3384_v9, 1  ;;  %v3138_v25 = vcombine.low %v2898_v16, %v3861_v53 }
  0x3b   : > { %3225 = vmatpush3.bf16.msra.mxu0 %v3493_v7  ;;  %v3388_v23 = vld [vmem:[%s3771_s7 + $0x98] ss:$0 sps:$4 sm:$0x33]   ;;  %3269 = vmatpush3.bf16.msra.mxu1 %v3493_v7  ;;  %v1675_v24 = vrot.slane %v3108_v11, 1  ;;  %v1674_v28 = vsel %vm742_vm0, %v1672_v14, %v1673_v15  ;;  %v1676_v29 = vrot.slane %v3386_v12, 1  ;;  %v1872_v35 = vrot.slane %v3154_v22, 2 }
  0x3c   : > { %v3390_v26 = vld [vmem:[%s3771_s7 + $0x38] ss:$0 sps:$4 sm:$0x33]   ;;  %v3392_v31 = vld [vmem:[%s3771_s7 + $0x80] ss:$0 sps:$4 sm:$0x11]   ;;  %v1701_v34 = vsel %vm742_vm0, %v1699_v17, %v1700_v21 }
  0x3d   : > { %1274 = vrot.lane.b32.xlu1 %v1237_v30, %s3679_s11  ;;  %v3496_v27 = vld [vmem:[%s4926_s1 + $0x18] sm:$0xff]   ;;  %v2966_v30 = vcombine.low %v322_v19, %v3900_v18  ;;  %v1848_v37 = vrot.slane %v3138_v25, 2  ;;  %v1849_v38 = vrot.slane %v3390_v26, 2  ;;  %v774_v45 = vrot.slane %v3392_v31, 1  ;;  %v293_v49 = vld [vmem:[%s3771_s7 + $0x88] sm:$0xf] }
  0x3e   : > { %1258 = vrot.lane.b32.xlu0 %v1213_v36, %s3679_s11  ;;  %v3917_v32 = vld [vmem:[%s3771_s7 + $0x1c] sm:$0xf]  ;;  %v306_v33 = vld [vmem:[%s3771_s7 + $0x18] sm:$0xe]  ;;  %3226 = vmatprep.subr.bf16.mxu0 %v3496_v27  ;;  %v1873_v36 = vrot.slane %v3388_v23, 2 }
  0x3f   : > { %3265 = vmatprep.subr.bf16.mxu1 %v3496_v27  ;;  %3227 = vmatpush3.bf16.msra.mxu0 %v3496_v27  ;;  %v2916_v39 = vld [vmem:[%s3771_s7 + $0x9c] sm:$0xc]  ;;  %v773_v41 = vrot.slane %v2966_v30, 1  ;;  %v2950_v42 = vcombine.low %v306_v33, %v3917_v32  ;;  %v3396_v46 = vld [vmem:[%s3771_s7 + $0xa4] ss:$0 sps:$4 sm:$0x33]   ;;  %v1850_v53 = vsel %vm919_vm1, %v1848_v37, %v1849_v38 }
  0x40   : > { %3270 = vmatpush3.bf16.msra.mxu1 %v3496_v27  ;;  %v2900_v44 = vld [vmem:[%s3771_s7 + $0x3c] sm:$0xc]  ;;  %v3156_v48 = vcombine.low %v2916_v39, %v3873_v60  ;;  %v324_v50 = vld [vmem:[%s3771_s7 + $0x84] sm:$0xe]  ;;  %v277_v56 = vld [vmem:[%s3771_s7 + $0x28] sm:$0xf] }
  0x41   : > { %1448 = vrot.lane.b32.xlu1 %v1410_v40, %s3680_s12  ;;  %v1677_v40 = vsel %vm742_vm0, %v1675_v24, %v1676_v29  ;;  %v3140_v51 = vcombine.low %v2900_v44, %v3881_v1  ;;  %v749_v54 = vrot.slane %v2950_v42, 1  ;;  %v308_v57 = vld [vmem:[%s3771_s7 + $0x24] sm:$0xe]  ;;  %v2968_v58 = vcombine.low %v324_v50, %v293_v49  ;;  %v354_v1 = vld [vmem:[%s3771_s7 + $0x78] sm:$0xc] }
  0x42   : > { %1432 = vrot.lane.b32.xlu0 %v1386_v43, %s3680_s12  ;;  %v3394_v43 = vld [vmem:[%s3771_s7 + $0x20] ss:$0 sps:$4 sm:$0x11]   ;;  %v775_v59 = vsel %vm742_vm0, %v773_v41, %v774_v45  ;;  %v1875_v60 = vrot.slane %v3156_v48, 2  ;;  %v1876_v61 = vrot.slane %v3396_v46, 2  ;;  %v2952_v0 = vcombine.low %v308_v57, %v277_v56 }
  0x43   : > { %v1851_v63 = vrot.slane %v3140_v51, 2  ;;  %v776_v5 = vrot.slane %v2968_v58, 1  ;;  %v338_v6 = vld [vmem:[%s3771_s7 + $0x18] sm:$0xc]  ;;  %v2998_v9 = vcombine.low %v354_v1, %v3900_v18  ;;  %v356_v12 = vld [vmem:[%s3771_s7 + $0x84] sm:$0xc] }
  0x44   : > { %v1877_v7 = vsel %vm919_vm1, %v1875_v60, %v1876_v61  ;;  %v752_v11 = vrot.slane %v2952_v0, 1  ;;  %v2982_v15 = vcombine.low %v338_v6, %v3917_v32  ;;  %v3406_v16 = vld [vmem:[%s3771_s7 + $0x20] ss:$0 sps:$4 sm:$0x33]   ;;  %v340_v17 = vld [vmem:[%s3771_s7 + $0x24] sm:$0xc]  ;;  %v3000_v18 = vcombine.low %v356_v12, %v293_v49 }
  0x45   : > { %1450 = vrot.lane.b32.xlu1 %v1413_v47, %s3680_s12  ;;  %v1874_v47 = vsel %vm919_vm1, %v1872_v35, %v1873_v36  ;;  %v3408_v22 = vld [vmem:[%s3771_s7 + $0x8c] ss:$0 sps:$4 sm:$0x33]   ;;  %v927_v25 = vrot.slane %v3406_v16, 2  ;;  %v2984_v26 = vcombine.low %v340_v17, %v277_v56  ;;  %v2758_v35 = vld [vmem:[%s3771_s7 + $0x90] sm:$0xf] }
  0x46   : > { %1434 = vrot.lane.b32.xlu0 %v1389_v52, %s3680_s12  ;;  %v3398_v52 = vld [vmem:[%s3771_s7 + $0x44] ss:$0 sps:$4 sm:$0x33]   ;;  %v926_v24 = vrot.slane %v2982_v15, 2  ;;  %v953_v29 = vrot.slane %v3000_v18, 2  ;;  %v954_v30 = vrot.slane %v3408_v22, 2 }
  0x47   : > { %v1852_v3 = vrot.slane %v3398_v52, 2  ;;  %v3410_v27 = vld [vmem:[%s3771_s7 + $0x2c] ss:$0 sps:$4 sm:$0x33]   ;;  %v929_v32 = vrot.slane %v2984_v26, 2 }
  0x48   : > { %v928_v31 = vsel %vm919_vm1, %v926_v24, %v927_v25  ;;  %v930_v33 = vrot.slane %v3410_v27, 2  ;;  %v2759_v36 = vld [vmem:[%s3771_s7 + $0x94] sm:$0xf]  ;;  %v2790_v37 = vld [vmem:[%s3771_s7 + $0x90] sm:$0xe] }
  0x49   : > { %1560 = vrot.lane.b32.xlu1 %v3098_v55, %s3681_s24  ;;  %v750_v55 = vrot.slane %v3394_v43, 1  ;;  %v1853_v13 = vsel %vm919_vm1, %v1851_v63, %v1852_v3  ;;  %v2742_v38 = vld [vmem:[%s3771_s7 + $0x30] sm:$0xf]  ;;  %v3020_v42 = vcombine.low %v2758_v35, %v2759_v36  ;;  %v2760_v43 = vld [vmem:[%s3771_s7 + $0x9c] sm:$0xf]  ;;  %v3046_v44 = vcombine.low %v2790_v37, %v2759_v36 }
  0x4a   : > { %1544 = vrot.lane.b32.xlu0 %v3090_v62, %s3681_s24  ;;  %v3400_v62 = vld [vmem:[%s3771_s7 + $0x8c] ss:$0 sps:$4 sm:$0x11]   ;;  %v931_v39 = vsel %vm919_vm1, %v929_v32, %v930_v33  ;;  %v2774_v41 = vld [vmem:[%s3771_s7 + $0x30] sm:$0xe] }
  0x4b   : > { %v751_v2 = vsel %vm742_vm0, %v749_v54, %v750_v55  ;;  %v777_v8 = vrot.slane %v3400_v62, 1  ;;  %v2761_v45 = vld [vmem:[%s3771_s7 + $0xa0] sm:$0xf]  ;;  %v3416_v46 = vld [vmem:[%s3771_s7 + $0x98] ss:$0 sps:$4 sm:$0x11]  }
  0x4c   : > { %v2744_v48 = vld [vmem:[%s3771_s7 + $0x3c] sm:$0xf]  ;;  %v2745_v51 = vld [vmem:[%s3771_s7 + $0x40] sm:$0xf]  ;;  %v1238_v54 = vrot.slane %v3046_v44, 1  ;;  %v1239_v56 = vrot.slane %v3416_v46, 1 }
  0x4d   : > { %1562 = vrot.lane.b32.xlu1 %v3099_v4, %s3681_s24  ;;  %v3402_v4 = vld [vmem:[%s3771_s7 + $0x2c] ss:$0 sps:$4 sm:$0x11]   ;;  %v778_v19 = vsel %vm742_vm0, %v776_v5, %v777_v8  ;;  %v2792_v50 = vld [vmem:[%s3771_s7 + $0x9c] sm:$0xe]  ;;  %v3013_v60 = vcombine.low %v2744_v48, %v2745_v51 }
  0x4e   : > { %1546 = vrot.lane.b32.xlu0 %v3091_v10, %s3681_s24  ;;  %v3404_v10 = vld [vmem:[%s3771_s7 + $0x80] ss:$0 sps:$4 sm:$0x33]   ;;  %v753_v14 = vrot.slane %v3402_v4, 1  ;;  %v2776_v55 = vld [vmem:[%s3771_s7 + $0x3c] sm:$0xe]  ;;  %v3048_v57 = vcombine.low %v2792_v50, %v2761_v45  ;;  %v1240_v3 = vsel %vm742_vm0, %v1238_v54, %v1239_v56 }
  0x4f   : > { %v951_v21 = vrot.slane %v3404_v10, 2  ;;  %v3418_v52 = vld [vmem:[%s3771_s7 + $0x38] ss:$0 sps:$4 sm:$0x11]   ;;  %v3032_v63 = vcombine.low %v2776_v55, %v2745_v51  ;;  %v2806_v1 = vld [vmem:[%s3771_s7 + $0x30] sm:$0xc] }
  0x50   : > { %v754_v23 = vsel %vm742_vm0, %v752_v11, %v753_v14  ;;  %v3420_v58 = vld [vmem:[%s3771_s7 + $0xa4] ss:$0 sps:$4 sm:$0x11]   ;;  %v1215_v62 = vrot.slane %v3418_v52, 1  ;;  %v1241_v4 = vrot.slane %v3048_v57, 1 }
  0x51   : > { %1736 = vrot.lane.b32.xlu1 %v1698_v20, %s3682_s6  ;;  %v950_v20 = vrot.slane %v2998_v9, 2  ;;  %v3422_v0 = vld [vmem:[%s3771_s7 + $0x44] ss:$0 sps:$4 sm:$0x11]   ;;  %v1242_v5 = vrot.slane %v3420_v58, 1  ;;  %v1217_v10 = vrot.slane %v3032_v63, 1 }
  0x52   : > { %1720 = vrot.lane.b32.xlu0 %v1674_v28, %s3682_s6  ;;  %v3424_v6 = vld [vmem:[%s3771_s7 + $0x98] ss:$0 sps:$4 sm:$0x33]   ;;  %v2824_v8 = vld [vmem:[%s3771_s7 + $0x9c] sm:$0xc]  ;;  %v1218_v11 = vrot.slane %v3422_v0, 1 }
  0x53   : > { %v952_v28 = vsel %vm919_vm1, %v950_v20, %v951_v21  ;;  %v3426_v12 = vld [vmem:[%s3771_s7 + $0x38] ss:$0 sps:$4 sm:$0x33]   ;;  %v2808_v14 = vld [vmem:[%s3771_s7 + $0x3c] sm:$0xc]  ;;  %v1243_v15 = vsel %vm742_vm0, %v1241_v4, %v1242_v5  ;;  %v1415_v16 = vrot.slane %v3424_v6, 2  ;;  %v3080_v17 = vcombine.low %v2824_v8, %v2761_v45 }
  0x54   : > { %v1219_v21 = vsel %vm742_vm0, %v1217_v10, %v1218_v11  ;;  %v1391_v18 = vrot.slane %v3426_v12, 2  ;;  %v3064_v22 = vcombine.low %v2808_v14, %v2745_v51  ;;  %v2855_v32 = vld [vmem:[%s3771_s7 + $0xac] sm:$0xf]  ;;  %v2886_v33 = vld [vmem:[%s3771_s7 + $0xa8] sm:$0xe] }
  0x55   : > { %1738 = vrot.lane.b32.xlu1 %v1701_v34, %s3682_s6  ;;  %v955_v34 = vsel %vm919_vm1, %v953_v29, %v954_v30  ;;  %v1417_v25 = vrot.slane %v3080_v17, 2  ;;  %v2854_v30 = vld [vmem:[%s3771_s7 + $0xa8] sm:$0xf]  ;;  %v3438_v48 = vld [vmem:[%s3771_s7 + $0x50] ss:$0 sps:$4 sm:$0x11]  }
  0x56   : > { %1722 = vrot.lane.b32.xlu0 %v1677_v40, %s3682_s6  ;;  %v2743_v40 = vld [vmem:[%s3771_s7 + $0x34] sm:$0xf]  ;;  %v2838_v35 = vld [vmem:[%s3771_s7 + $0x48] sm:$0xf]  ;;  %v1679_v58 = vrot.slane %v3438_v48, 1 }
  0x57   : > { %v3030_v49 = vcombine.low %v2774_v41, %v2743_v40  ;;  %v2870_v37 = vld [vmem:[%s3771_s7 + $0x48] sm:$0xe]  ;;  %v3126_v41 = vcombine.low %v2886_v33, %v2855_v32  ;;  %v2872_v52 = vld [vmem:[%s3771_s7 + $0x54] sm:$0xe]  ;;  %v326_v6 = vld [vmem:[%s3771_s7 + $0x90] sm:$0xe] }
  0x58   : > { %v3442_v54 = vld [vmem:[%s3771_s7 + $0xbc] ss:$0 sps:$4 sm:$0x11]   ;;  %v2918_v55 = vld [vmem:[%s3771_s7 + $0xa8] sm:$0xc] }
  0x59   : > { %1912 = vrot.lane.b32.xlu1 %v1874_v47, %s3683_s13  ;;  %v3012_v47 = vcombine.low %v2742_v38, %v2743_v40  ;;  %v1214_v61 = vrot.slane %v3030_v49, 1  ;;  %v3100_v38 = vcombine.low %v2854_v30, %v2855_v32  ;;  %v1702_v50 = vrot.slane %v3126_v41, 1  ;;  %v3448_v0 = vld [vmem:[%s3771_s7 + $0xb0] ss:$0 sps:$4 sm:$0x33]  }
  0x5a   : > { %1896 = vrot.lane.b32.xlu0 %v1850_v53, %s3683_s13  ;;  %v3021_v53 = vcombine.low %v2760_v43, %v2761_v45  ;;  %v2888_v43 = vld [vmem:[%s3771_s7 + $0xb4] sm:$0xe]  ;;  %v3158_v63 = vcombine.low %v2918_v55, %v2855_v32  ;;  %v310_v12 = vld [vmem:[%s3771_s7 + $0x30] sm:$0xe]  ;;  %v1879_v14 = vrot.slane %v3448_v0, 2 }
  0x5b   : > { %v1216_v9 = vsel %vm742_vm0, %v1214_v61, %v1215_v62  ;;  %v2840_v45 = vld [vmem:[%s3771_s7 + $0x54] sm:$0xf]  ;;  %v2902_v61 = vld [vmem:[%s3771_s7 + $0x48] sm:$0xc]  ;;  %v328_v32 = vld [vmem:[%s3771_s7 + $0x9c] sm:$0xe] }
  0x5c   : > { %v4051_v5 = vld [vmem:[%s3771_s7 + $0x94] sm:$0xf]  ;;  %v1878_v10 = vrot.slane %v3158_v63, 2  ;;  %v312_v41 = vld [vmem:[%s3771_s7 + $0x3c] sm:$0xe] }
  0x5d   : > { %811 = vrot.lane.b32.xlu1 %v775_v59, %s3676_s8  ;;  %v2822_v59 = vld [vmem:[%s3771_s7 + $0x90] sm:$0xc]  ;;  %v4057_v11 = vld [vmem:[%s3771_s7 + $0x34] sm:$0xf]  ;;  %v3501_v55 = vld [vmem:[%s4926_s1 + $0x20] ss:$0 sps:$4 sm:$0xff]  }
  0x5e   : > { %795 = vrot.lane.b32.xlu0 %v751_v2, %s3676_s8  ;;  %v3078_v2 = vcombine.low %v2822_v59, %v2759_v36  ;;  %v2839_v36 = vld [vmem:[%s3771_s7 + $0x4c] sm:$0xf]  ;;  %v358_v48 = vld [vmem:[%s3771_s7 + $0x90] sm:$0xc]  ;;  %3272 = vmatprep.subr.msk.bf16.mxu0 %vm2277_vm2, %v3501_v55 }
  0x5f   : > { %v3092_v44 = vcombine.low %v2838_v35, %v2839_v36  ;;  %v3110_v46 = vcombine.low %v2870_v37, %v2839_v36  ;;  %v3142_v4 = vcombine.low %v2902_v61, %v2839_v36  ;;  %v3464_v61 = vld [vmem:[%s3771_s7 + $0x98] ss:$0 sps:$4 sm:$0x33]   ;;  %3273 = vmatprep.subr.msk.bf16.mxu1 %vm2277_vm2, %v3501_v55 }
  0x61   : > { %1914 = vrot.lane.b32.xlu1 %v1877_v7, %s3683_s13  ;;  %v3062_v7 = vcombine.low %v2806_v1, %v2743_v40  ;;  %v4024_v40 = vld [vmem:[%s3771_s7 + $0xb8] sm:$0xf]  ;;  %v1678_v57 = vrot.slane %v3110_v46, 1 }
  0x62   : > { %1898 = vrot.lane.b32.xlu0 %v1853_v13, %s3683_s13  ;;  %v1414_v13 = vrot.slane %v3078_v2, 2  ;;  %v3128_v51 = vcombine.low %v2888_v43, %v4024_v40  ;;  %v1706_v2 = vrot.slane %v3442_v54, 1  ;;  %v3460_v43 = vld [vmem:[%s3771_s7 + $0xa4] ss:$0 sps:$4 sm:$0x11]  }
  0x63   : > { %v1390_v20 = vrot.slane %v3062_v7, 2  ;;  %v1680_v7 = vsel %vm742_vm0, %v1678_v57, %v1679_v58  ;;  %v342_v54 = vld [vmem:[%s3771_s7 + $0x30] sm:$0xc]  ;;  %v783_v58 = vrot.slane %v3460_v43, 1  ;;  %v4160_v43 = vld [vmem:[%s3771_s7 + $0xb8] sm:$0xf] }
  0x64   : > { %v1416_v24 = vsel %vm919_vm1, %v1414_v13, %v1415_v16  ;;  %v1705_v62 = vrot.slane %v3128_v51, 1  ;;  %v3452_v16 = vld [vmem:[%s3771_s7 + $0x98] ss:$0 sps:$4 sm:$0x11]  }
  0x65   : > { %813 = vrot.lane.b32.xlu1 %v778_v19, %s3676_s8  ;;  %v3428_v19 = vld [vmem:[%s3771_s7 + $0xa4] ss:$0 sps:$4 sm:$0x33]   ;;  %v1392_v27 = vsel %vm919_vm1, %v1390_v20, %v1391_v18 }
  0x66   : > { %797 = vrot.lane.b32.xlu0 %v754_v23, %s3676_s8  ;;  %v3430_v23 = vld [vmem:[%s3771_s7 + $0x44] ss:$0 sps:$4 sm:$0x33]   ;;  %v1418_v26 = vrot.slane %v3428_v19, 2  ;;  %v1707_v13 = vsel %vm742_vm0, %v1705_v62, %v1706_v2  ;;  %v1854_v19 = vrot.slane %v3142_v4, 2  ;;  %v2279_v62 = vsel %vm2277_vm2, %v3501_v55, 0 }
  0x67   : > { %v1394_v29 = vrot.slane %v3430_v23, 2  ;;  %v3454_v23 = vld [vmem:[%s3771_s7 + $0x38] ss:$0 sps:$4 sm:$0x11]   ;;  %v360_v2 = vld [vmem:[%s3771_s7 + $0x9c] sm:$0xc]  ;;  %3229 = vmatpush3.bf16.msra.mxu0 %v2279_v62  ;;  %3271 = vmatpush3.bf16.msra.mxu1 %v2279_v62 }
  0x68   : > { %v756_v37 = vrot.slane %v3454_v23, 1  ;;  %v3480_v62 = vld [vmem:[%s3771_s7 + $0xbc] ss:$0 sps:$4 sm:$0x11]  }
  0x69   : > { %988 = vrot.lane.b32.xlu1 %v952_v28, %s3677_s9  ;;  %v1393_v28 = vrot.slane %v3064_v22, 2  ;;  %v2954_v22 = vcombine.low %v310_v12, %v4057_v11 }
  0x6a   : > { %972 = vrot.lane.b32.xlu0 %v928_v31, %s3677_s9  ;;  %v1419_v31 = vsel %vm919_vm1, %v1417_v25, %v1418_v26  ;;  %v2904_v26 = vld [vmem:[%s3771_s7 + $0x54] sm:$0xc] }
  0x6b   : > { %v755_v36 = vrot.slane %v2954_v22, 1 }
  0x6d   : > { %990 = vrot.lane.b32.xlu1 %v955_v34, %s3677_s9  ;;  %v1395_v34 = vsel %vm919_vm1, %v1393_v28, %v1394_v29  ;;  %v780_v29 = vrot.slane %v3452_v16, 1  ;;  %v757_v51 = vsel %vm742_vm0, %v755_v36, %v756_v37  ;;  %v2746_v37 = vld [vmem:[%s3771_s7 + $0x48] sm:$0xf] }
  0x6e   : > { %974 = vrot.lane.b32.xlu0 %v931_v39, %s3677_s9  ;;  %v2856_v39 = vld [vmem:[%s3771_s7 + $0xb4] sm:$0xf] }
  0x6f   : > { %v3101_v49 = vcombine.low %v2856_v39, %v4024_v40  ;;  %v4088_v39 = vld [vmem:[%s3771_s7 + $0x40] sm:$0xf] }
  0x71   : > { %1100 = vrot.lane.b32.xlu1 %v3020_v42, %s3678_s10  ;;  %v3436_v42 = vld [vmem:[%s3771_s7 + $0xb0] ss:$0 sps:$4 sm:$0x11]  }
  0x72   : > { %1084 = vrot.lane.b32.xlu0 %v3012_v47, %s3678_s10  ;;  %v4031_v47 = vld [vmem:[%s3771_s7 + $0x58] sm:$0xf] }
  0x73   : > { %v3093_v56 = vcombine.low %v2840_v45, %v4031_v47  ;;  %v3112_v59 = vcombine.low %v2872_v52, %v4031_v47 }
  0x75   : > { %1102 = vrot.lane.b32.xlu1 %v3021_v53, %s3678_s10  ;;  %v1703_v53 = vrot.slane %v3436_v42, 1  ;;  %v1681_v8 = vrot.slane %v3112_v59, 1  ;;  %v3002_v59 = vcombine.low %v358_v48, %v4051_v5  ;;  %v2796_v48 = vld [vmem:[%s3771_s7 + $0xb4] sm:$0xe] }
  0x76   : > { %1086 = vrot.lane.b32.xlu0 %v3013_v60, %s3678_s10  ;;  %v3444_v60 = vld [vmem:[%s3771_s7 + $0x5c] ss:$0 sps:$4 sm:$0x11]  }
  0x77   : > { %v1704_v1 = vsel %vm742_vm0, %v1702_v50, %v1703_v53  ;;  %v3462_v50 = vld [vmem:[%s3771_s7 + $0x44] ss:$0 sps:$4 sm:$0x11]  }
  0x78   : > { %v759_v4 = vrot.slane %v3462_v50, 1 }
  0x79   : > { %1276 = vrot.lane.b32.xlu1 %v1240_v3, %s3679_s11  ;;  %v3450_v3 = vld [vmem:[%s3771_s7 + $0x50] ss:$0 sps:$4 sm:$0x33]  }
  0x7a   : > { %1260 = vrot.lane.b32.xlu0 %v1216_v9, %s3679_s11  ;;  %v1682_v9 = vrot.slane %v3444_v60, 1  ;;  %v1855_v20 = vrot.slane %v3450_v3, 2 }
  0x7c   : > { %v1683_v18 = vsel %vm742_vm0, %v1681_v8, %v1682_v9  ;;  %v1856_v35 = vsel %vm919_vm1, %v1854_v19, %v1855_v20  ;;  %v344_v8 = vld [vmem:[%s3771_s7 + $0x3c] sm:$0xc]  ;;  %v3470_v20 = vld [vmem:[%s3771_s7 + $0x44] ss:$0 sps:$4 sm:$0x33]  }
  0x7d   : > { %1278 = vrot.lane.b32.xlu1 %v1243_v15, %s3679_s11  ;;  %v2970_v15 = vcombine.low %v326_v6, %v4051_v5  ;;  %v3466_v5 = vld [vmem:[%s3771_s7 + $0x38] ss:$0 sps:$4 sm:$0x33]   ;;  %v2988_v19 = vcombine.low %v344_v8, %v4088_v39  ;;  %v2810_v8 = vld [vmem:[%s3771_s7 + $0x48] sm:$0xc] }
  0x7e   : > { %1262 = vrot.lane.b32.xlu0 %v1219_v21, %s3679_s11  ;;  %v2920_v21 = vld [vmem:[%s3771_s7 + $0xb4] sm:$0xc]  ;;  %v933_v16 = vrot.slane %v3466_v5, 2 }
  0x7f   : > { %v779_v28 = vrot.slane %v2970_v15, 1  ;;  %v3160_v30 = vcombine.low %v2920_v21, %v4024_v40 }
  0x81   : > { %1452 = vrot.lane.b32.xlu1 %v1416_v24, %s3680_s12  ;;  %v3456_v24 = vld [vmem:[%s3771_s7 + $0xbc] ss:$0 sps:$4 sm:$0x33]   ;;  %v1881_v45 = vrot.slane %v3160_v30, 2  ;;  %v2762_v30 = vld [vmem:[%s3771_s7 + $0xa8] sm:$0xf] }
  0x82   : > { %1436 = vrot.lane.b32.xlu0 %v1392_v27, %s3680_s12  ;;  %v1880_v27 = vsel %vm919_vm1, %v1878_v10, %v1879_v14  ;;  %v1882_v46 = vrot.slane %v3456_v24, 2  ;;  %v957_v10 = vrot.slane %v3464_v61, 2 }
  0x84   : > { %v1883_v60 = vsel %vm919_vm1, %v1881_v45, %v1882_v46  ;;  %v2778_v45 = vld [vmem:[%s3771_s7 + $0x48] sm:$0xe]  ;;  %v3476_v46 = vld [vmem:[%s3771_s7 + $0xb0] ss:$0 sps:$4 sm:$0x11]  }
  0x85   : > { %1454 = vrot.lane.b32.xlu1 %v1419_v31, %s3680_s12  ;;  %v4078_v31 = vld [vmem:[%s3771_s7 + $0xa0] sm:$0xf]  ;;  %v1245_v61 = vrot.slane %v3476_v46, 1 }
  0x86   : > { %1438 = vrot.lane.b32.xlu0 %v1395_v34, %s3680_s12  ;;  %v3458_v34 = vld [vmem:[%s3771_s7 + $0x5c] ss:$0 sps:$4 sm:$0x33]   ;;  %v2972_v42 = vcombine.low %v328_v32, %v4078_v31  ;;  %v3004_v12 = vcombine.low %v360_v2, %v4078_v31  ;;  %v2763_v32 = vld [vmem:[%s3771_s7 + $0xac] sm:$0xf] }
  0x87   : > { %v1858_v53 = vrot.slane %v3458_v34, 2  ;;  %v2794_v34 = vld [vmem:[%s3771_s7 + $0xa8] sm:$0xe]  ;;  %v3482_v2 = vld [vmem:[%s3771_s7 + $0x5c] ss:$0 sps:$4 sm:$0x11]  }
  0x88   : > { %v782_v57 = vrot.slane %v2972_v42, 1  ;;  %v959_v22 = vrot.slane %v3004_v12, 2  ;;  %v3022_v42 = vcombine.low %v2762_v30, %v2763_v32 }
  0x89   : > { %1564 = vrot.lane.b32.xlu1 %v3100_v38, %s3681_s24  ;;  %v3144_v38 = vcombine.low %v2904_v26, %v4031_v47 }
  0x8a   : > { %1548 = vrot.lane.b32.xlu0 %v3092_v44, %s3681_s24  ;;  %v781_v44 = vsel %vm742_vm0, %v779_v28, %v780_v29  ;;  %v784_v9 = vsel %vm742_vm0, %v782_v57, %v783_v58  ;;  %v936_v28 = vrot.slane %v3470_v20, 2  ;;  %v2828_v20 = vld [vmem:[%s3771_s7 + $0xb4] sm:$0xc] }
  0x8b   : > { %v1857_v52 = vrot.slane %v3144_v38, 2  ;;  %v2747_v38 = vld [vmem:[%s3771_s7 + $0x4c] sm:$0xf] }
  0x8c   : > { %v3014_v50 = vcombine.low %v2746_v37, %v2747_v38 }
  0x8d   : > { %1566 = vrot.lane.b32.xlu1 %v3101_v49, %s3681_s24  ;;  %v2956_v49 = vcombine.low %v312_v41, %v4088_v39  ;;  %v1859_v3 = vsel %vm919_vm1, %v1857_v52, %v1858_v53  ;;  %v2764_v39 = vld [vmem:[%s3771_s7 + $0xb4] sm:$0xf]  ;;  %v4170_v52 = vld [vmem:[%s3771_s7 + $0x58] sm:$0xf]  ;;  %v3034_v53 = vcombine.low %v2778_v45, %v2747_v38 }
  0x8e   : > { %1550 = vrot.lane.b32.xlu0 %v3093_v56, %s3681_s24  ;;  %v3023_v57 = vcombine.low %v2764_v39, %v4160_v43  ;;  %v3492_v45 = vld [vmem:[%s3771_s7 + $0x5c] ss:$0 sps:$4 sm:$0x33]  }
  0x8f   : > { %v758_v0 = vrot.slane %v2956_v49, 1 }
  0x91   : > { %1740 = vrot.lane.b32.xlu1 %v1704_v1, %s3682_s6  ;;  %v2986_v1 = vcombine.low %v342_v54, %v4057_v11  ;;  %v3468_v11 = vld [vmem:[%s3771_s7 + $0xa4] ss:$0 sps:$4 sm:$0x33]   ;;  %v760_v15 = vsel %vm742_vm0, %v758_v0, %v759_v4  ;;  %v3478_v54 = vld [vmem:[%s3771_s7 + $0x50] ss:$0 sps:$4 sm:$0x11]  }
  0x92   : > { %1724 = vrot.lane.b32.xlu0 %v1680_v7, %s3682_s6  ;;  %v956_v7 = vrot.slane %v3002_v59, 2  ;;  %v960_v23 = vrot.slane %v3468_v11, 2  ;;  %v3052_v59 = vcombine.low %v2796_v48, %v4160_v43  ;;  %v1220_v4 = vrot.slane %v3034_v53, 1  ;;  %v272_v53 = vld [vmem:[%s3771_s7 + $0xc] sm:$0xf] }
  0x93   : > { %v4064_v17 = vpop.permute.xlu1 %793  ;;  %v932_v14 = vrot.slane %v2986_v1, 2  ;;  %v1221_v5 = vrot.slane %v3478_v54, 1  ;;  %v1248_v11 = vrot.slane %v3480_v62, 1  ;;  %v270_v54 = vld [vmem:[%s3771_s7] sm:$0xf] }
  0x94   : > { %v4071_v25 = vpop.permute.xlu0 %791  ;;  %v961_v31 = vsel %vm919_vm1, %v959_v22, %v960_v23  ;;  %v1224_v23 = vrot.slane %v3482_v2, 1  ;;  %v2858_v2 = vld [vmem:[%s3771_s7 + $0xc0] sm:$0xf] }
  0x95   : > { %1742 = vrot.lane.b32.xlu1 %v1707_v13, %s3682_s6  ;;  %v934_v26 = vsel %vm919_vm1, %v932_v14, %v933_v16 }
  0x96   : > { %1726 = vrot.lane.b32.xlu0 %v1683_v18, %s3682_s6  ;;  %v958_v18 = vsel %vm919_vm1, %v956_v7, %v957_v10  ;;  %v1247_v10 = vrot.slane %v3052_v59, 1  ;;  %v1400_v59 = vrot.slane %v3492_v45, 2  ;;  %v4268_v45 = vld [vmem:[%s3771_s7 + $0x70] sm:$0xf] }
  0x97   : > { %v4082_v33 = vpop.permute.xlu1 %809 }
  0x98   : > { %v4091_v40 = vpop.permute.xlu0 %807  ;;  %v1249_v30 = vsel %vm742_vm0, %v1247_v10, %v1248_v11  ;;  %v3586_v10 = vld [vmem:[%s3771_s7 + $0x4] sm:$0xf] }
  0x99   : > { %1916 = vrot.lane.b32.xlu1 %v1880_v27, %s3683_s13  ;;  %v935_v27 = vrot.slane %v2988_v19, 2  ;;  %v3066_v19 = vcombine.low %v2810_v8, %v2747_v38 }
  0x9a   : > { %1900 = vrot.lane.b32.xlu0 %v1856_v35, %s3683_s13 }
  0x9b   : > { %v4099_v47 = vpop.permute.xlu1 %984  ;;  %v937_v36 = vsel %vm919_vm1, %v935_v27, %v936_v28  ;;  %v2812_v28 = vld [vmem:[%s3771_s7 + $0x54] sm:$0xc]  ;;  %v1396_v38 = vrot.slane %v3066_v19, 2 }
  0x9c   : > { %v4108_v56 = vpop.permute.xlu0 %968 }
  0x9d   : > { %815 = vrot.lane.b32.xlu1 %v781_v44, %s3676_s8  ;;  %v3050_v44 = vcombine.low %v2794_v34, %v2763_v32  ;;  %v3084_v34 = vcombine.low %v2828_v20, %v4160_v43  ;;  %v286_v43 = vld [vmem:[%s3771_s7 + $0x60] sm:$0xf] }
  0x9e   : > { %799 = vrot.lane.b32.xlu0 %v757_v51, %s3676_s8  ;;  %v2748_v51 = vld [vmem:[%s3771_s7 + $0x54] sm:$0xf]  ;;  %v2842_v20 = vld [vmem:[%s3771_s7 + $0x60] sm:$0xf] }
  0x9f   : > { %v4115_v63 = vpop.permute.xlu1 %986  ;;  %v1244_v58 = vrot.slane %v3050_v44, 1  ;;  %v3015_v1 = vcombine.low %v2748_v51, %v4170_v52  ;;  %v3068_v44 = vcombine.low %v2812_v28, %v4170_v52  ;;  %v2860_v28 = vld [vmem:[%s3771_s7 + $0xcc] sm:$0xf] }
  0xa0   : > { %v4121_v6 = vpop.permute.xlu0 %970 }
  0xa1   : > { %1918 = vrot.lane.b32.xlu1 %v1883_v60, %s3683_s13  ;;  %v2780_v60 = vld [vmem:[%s3771_s7 + $0x54] sm:$0xe]  ;;  %v1246_v12 = vsel %vm742_vm0, %v1244_v58, %v1245_v61  ;;  %v1399_v58 = vrot.slane %v3068_v44, 2  ;;  %v3584_v61 = vld [vmem:[%s3771_s7 + $0x64] sm:$0xf] }
  0xa2   : > { %1902 = vrot.lane.b32.xlu0 %v1859_v3, %s3683_s13  ;;  %v2826_v3 = vld [vmem:[%s3771_s7 + $0xa8] sm:$0xc]  ;;  %v3036_v7 = vcombine.low %v2780_v60, %v4170_v52  ;;  %v288_v60 = vld [vmem:[%s3771_s7 + $0x6c] sm:$0xf]  ;;  %v2938_v62 = vcombine.low %v286_v43, %v3584_v61 }
  0xa3   : > { %v4129_v13 = vpop.permute.xlu1 %1096  ;;  %v3082_v14 = vcombine.low %v2826_v3, %v2763_v32  ;;  %v1401_v19 = vsel %vm919_vm1, %v1399_v58, %v1400_v59  ;;  %v2892_v43 = vld [vmem:[%s3771_s7 + $0xcc] sm:$0xe] }
  0xa4   : > { %v4134_v21 = vpop.permute.xlu0 %1080  ;;  %v1223_v22 = vrot.slane %v3036_v7, 1  ;;  %v3585_v7 = vld [vmem:[%s3771_s7 + $0x10] sm:$0xf] }
  0xa5   : > { %817 = vrot.lane.b32.xlu1 %v784_v9, %s3676_s8  ;;  %v2931_v8 = vcombine.low %v272_v53, %v3585_v7 }
  0xa6   : > { %801 = vrot.lane.b32.xlu0 %v760_v15, %s3676_s8  ;;  %v3485_v15 = vld [vmem:[%s3771_s7 + $0xb0] ss:$0 sps:$4 sm:$0x33]   ;;  %v1225_v39 = vsel %vm742_vm0, %v1223_v22, %v1224_v23  ;;  %v1955_v22 = vsel %vm1928_vm3, %v2938_v62, %v4091_v40  ;;  %v3503_v40 = vld [vmem:[%s3771_s7 + $0xc8] ss:$0 sps:$4 sm:$0x11]  }
  0xa7   : > { %v4139_v24 = vpop.permute.xlu1 %1098  ;;  %v1421_v32 = vrot.slane %v3485_v15, 2  ;;  %v1709_v59 = vrot.slane %v3503_v40, 1 }
  0xa8   : > { %v4142_v29 = vpop.permute.xlu0 %1082 }
  0xa9   : > { %992 = vrot.lane.b32.xlu1 %v958_v18, %s3677_s9  ;;  %v1222_v18 = vsel %vm742_vm0, %v1220_v4, %v1221_v5  ;;  %v4231_v4 = vld [vmem:[%s3771_s7 + $0xc4] sm:$0xf]  ;;  %v2890_v5 = vld [vmem:[%s3771_s7 + $0xc0] sm:$0xe] }
  0xaa   : > { %976 = vrot.lane.b32.xlu0 %v934_v26, %s3677_s9  ;;  %v3487_v26 = vld [vmem:[%s3771_s7 + $0x50] ss:$0 sps:$4 sm:$0x33]  }
  0xab   : > { %v4150_v35 = vpop.permute.xlu1 %1272 }
  0xac   : > { %v4156_v41 = vpop.permute.xlu0 %1256 }
  0xad   : > { %994 = vrot.lane.b32.xlu1 %v961_v31, %s3677_s9  ;;  %v1420_v31 = vrot.slane %v3082_v14, 2  ;;  %v3587_v14 = vld [vmem:[%s3771_s7 + $0x70] sm:$0xf] }
  0xae   : > { %978 = vrot.lane.b32.xlu0 %v937_v36, %s3677_s9  ;;  %v3490_v36 = vld [vmem:[%s3771_s7 + $0xbc] ss:$0 sps:$4 sm:$0x33]   ;;  %v2939_v15 = vcombine.low %v288_v60, %v3587_v14  ;;  %v3507_v60 = vld [vmem:[%s3771_s7 + $0xd4] ss:$0 sps:$4 sm:$0x11]  }
  0xaf   : > { %v4166_v49 = vpop.permute.xlu1 %1274  ;;  %v1422_v48 = vsel %vm919_vm1, %v1420_v31, %v1421_v32  ;;  %v1424_v51 = vrot.slane %v3490_v36, 2  ;;  %v3130_v31 = vcombine.low %v2890_v5, %v4231_v4  ;;  %v2874_v32 = vld [vmem:[%s3771_s7 + $0x60] sm:$0xe]  ;;  %v2844_v36 = vld [vmem:[%s3771_s7 + $0x6c] sm:$0xf] }
  0xb0   : > { %v4173_v55 = vpop.permute.xlu0 %1258 }
  0xb1   : > { %1104 = vrot.lane.b32.xlu1 %v3022_v42, %s3678_s10  ;;  %v1397_v42 = vrot.slane %v3487_v26, 2  ;;  %v3102_v26 = vcombine.low %v2858_v2, %v4231_v4 }
  0xb2   : > { %1088 = vrot.lane.b32.xlu0 %v3014_v50, %s3678_s10  ;;  %v1423_v50 = vrot.slane %v3084_v34, 2  ;;  %v1995_v34 = vsel %vm1977_vm4, %v1955_v22, %v4099_v47 }
  0xb3   : > { %v4181_v0 = vpop.permute.xlu1 %1448 }
  0xb4   : > { %v4188_v9 = vpop.permute.xlu0 %1432  ;;  %v1425_v3 = vsel %vm919_vm1, %v1423_v50, %v1424_v51  ;;  %v3505_v50 = vld [vmem:[%s3771_s7 + $0x68] ss:$0 sps:$4 sm:$0x11]   ;;  %v2876_v51 = vld [vmem:[%s3771_s7 + $0x6c] sm:$0xe] }
  0xb5   : > { %1106 = vrot.lane.b32.xlu1 %v3023_v57, %s3678_s10  ;;  %v1398_v57 = vsel %vm919_vm1, %v1396_v38, %v1397_v42  ;;  %v1934_v38 = vsel %vm1928_vm3, %v2931_v8, %v4064_v17  ;;  %v2028_v42 = vsel %vm2010_vm5, %v1995_v34, %v4129_v13  ;;  %v330_v34 = vld [vmem:[%s3771_s7 + $0xa8] sm:$0xe] }
  0xb6   : > { %1090 = vrot.lane.b32.xlu0 %v3015_v1, %s3678_s10 }
  0xb7   : > { %v4194_v16 = vpop.permute.xlu1 %1450 }
  0xb8   : > { %v4199_v27 = vpop.permute.xlu0 %1434 }
  0xb9   : > { %1280 = vrot.lane.b32.xlu1 %v1246_v12, %s3679_s11  ;;  %v2930_v12 = vcombine.low %v270_v54, %v3586_v10  ;;  %v1685_v10 = vrot.slane %v3505_v50, 1 }
  0xba   : > { %1264 = vrot.lane.b32.xlu0 %v1222_v18, %s3679_s11  ;;  %v4241_v18 = vld [vmem:[%s3771_s7 + $0x64] sm:$0xf] }
  0xbb   : > { %v4207_v37 = vpop.permute.xlu1 %1560  ;;  %v3094_v47 = vcombine.low %v2842_v20, %v4241_v18  ;;  %v3114_v13 = vcombine.low %v2874_v32, %v4241_v18  ;;  %v4323_v32 = vld [vmem:[%s3771_s7 + $0xac] sm:$0xf] }
  0xbc   : > { %v4212_v46 = vpop.permute.xlu0 %1544 }
  0xbd   : > { %1282 = vrot.lane.b32.xlu1 %v1249_v30, %s3679_s11  ;;  %v4249_v30 = vld [vmem:[%s3771_s7 + $0xd0] sm:$0xf]  ;;  %v1684_v8 = vrot.slane %v3114_v13, 1 }
  0xbe   : > { %1266 = vrot.lane.b32.xlu0 %v1225_v39, %s3679_s11  ;;  %v1931_v39 = vsel %vm1928_vm3, %v2930_v12, %v4071_v25  ;;  %v2061_v25 = vsel %vm2043_vm6, %v2028_v42, %v4150_v35  ;;  %v2906_v12 = vld [vmem:[%s3771_s7 + $0x60] sm:$0xc] }
  0xbf   : > { %v4218_v52 = vpop.permute.xlu1 %1562  ;;  %v1979_v17 = vsel %vm1977_vm4, %v1931_v39, %v4108_v56  ;;  %v2094_v54 = vsel %vm2076_vm7, %v2061_v25, %v4181_v0  ;;  %v1708_v56 = vrot.slane %v3130_v31, 1  ;;  %v2922_v0 = vld [vmem:[%s3771_s7 + $0xc0] sm:$0xc]  ;;  %v3146_v31 = vcombine.low %v2906_v12, %v4241_v18  ;;  %v3515_v39 = vld [vmem:[%s3771_s7 + $0x68] ss:$0 sps:$4 sm:$0x33]  }
  0xc0   : > { %v4225_v1 = vpop.permute.xlu0 %1546  ;;  %v2012_v53 = vsel %vm2010_vm5, %v1979_v17, %v4134_v21  ;;  %v2127_v58 = vsel %vm2109_vm8, %v2094_v54, %v4207_v37  ;;  %v3132_v21 = vcombine.low %v2892_v43, %v4249_v30  ;;  %v3509_v37 = vld [vmem:[%s3771_s7 + $0x74] ss:$0 sps:$4 sm:$0x11]   ;;  %v1686_v40 = vsel %vm742_vm0, %v1684_v8, %v1685_v10  ;;  %v3517_v25 = vld [vmem:[%s3771_s7 + $0xb0] ss:$0 sps:$4 sm:$0x11]  }
  0xc1   : > { %1456 = vrot.lane.b32.xlu1 %v1422_v48, %s3680_s12  ;;  %v1958_v48 = vsel %vm1928_vm3, %v2939_v15, %v4082_v33  ;;  %v3103_v33 = vcombine.low %v2860_v28, %v4249_v30  ;;  %v2045_v35 = vsel %vm2043_vm6, %v2012_v53, %v4156_v41  ;;  %v3095_v41 = vcombine.low %v2844_v36, %v4268_v45  ;;  %v2924_v54 = vld [vmem:[%s3771_s7 + $0xcc] sm:$0xc]  ;;  %v3523_v8 = vld [vmem:[%s3771_s7 + $0x74] ss:$0 sps:$4 sm:$0x33]  }
  0xc2   : > { %1440 = vrot.lane.b32.xlu0 %v1398_v57, %s3680_s12  ;;  %v2078_v61 = vsel %vm2076_vm7, %v2045_v35, %v4188_v9  ;;  %v1997_v9 = vsel %vm1977_vm4, %v1958_v48, %v4115_v63  ;;  %v3162_v15 = vcombine.low %v2922_v0, %v4231_v4  ;;  %v1710_v20 = vsel %vm742_vm0, %v1708_v56, %v1709_v59  ;;  %v314_v48 = vld [vmem:[%s3771_s7 + $0x48] sm:$0xe]  ;;  %v3519_v35 = vld [vmem:[%s3771_s7 + $0x50] ss:$0 sps:$4 sm:$0x11]  }
  0xc3   : > { %v1737_v11 = vpop.permute.xlu1 %1736  ;;  %v2111_v5 = vsel %vm2109_vm8, %v2078_v61, %v4212_v46  ;;  %v3513_v46 = vld [vmem:[%s3771_s7 + $0xc8] ss:$0 sps:$4 sm:$0x33]   ;;  %v1711_v22 = vrot.slane %v3132_v21, 1  ;;  %v2030_v63 = vsel %vm2010_vm5, %v1997_v9, %v4139_v24  ;;  %v1688_v4 = vrot.slane %v3509_v37, 1 }
  0xc4   : > { %v1721_v23 = vpop.permute.xlu0 %1720  ;;  %v2160_v62 = vsel %vm2142_vm9, %v2127_v58, %v1737_v11  ;;  %v1981_v36 = vsel %vm1977_vm4, %v1934_v38, %v4121_v6  ;;  %v2063_v24 = vsel %vm2043_vm6, %v2030_v63, %v4166_v49  ;;  %v1884_v43 = vrot.slane %v3162_v15, 2  ;;  %v4340_v38 = vld [vmem:[%s3771_s7 + $0x4c] sm:$0xf]  ;;  %v4386_v10 = vld [vmem:[%s3771_s7 + $0x58] sm:$0xf] }
  0xc5   : > { %1458 = vrot.lane.b32.xlu1 %v1425_v3, %s3680_s12  ;;  %v3116_v3 = vcombine.low %v2876_v51, %v4268_v45  ;;  %v2144_v11 = vsel %vm2142_vm9, %v2111_v5, %v1721_v23  ;;  %v2014_v42 = vsel %vm2010_vm5, %v1981_v36, %v4142_v29  ;;  %v1885_v6 = vrot.slane %v3513_v46, 2  ;;  %v316_v12 = vld [vmem:[%s3771_s7 + $0x54] sm:$0xe]  ;;  %v3525_v46 = vld [vmem:[%s3771_s7 + $0xbc] ss:$0 sps:$4 sm:$0x11]  }
  0xc6   : > { %1442 = vrot.lane.b32.xlu0 %v1401_v19, %s3680_s12  ;;  %v2047_v49 = vsel %vm2043_vm6, %v2014_v42, %v4173_v55  ;;  %v1860_v53 = vrot.slane %v3146_v31, 2  ;;  %v1861_v56 = vrot.slane %v3515_v39, 2  ;;  %v786_v0 = vrot.slane %v3517_v25, 1  ;;  %v346_v31 = vld [vmem:[%s3771_s7 + $0x48] sm:$0xc] }
  0xc7   : > { %v4264_v44 = vpop.permute.xlu1 %1738  ;;  %v1687_v28 = vrot.slane %v3116_v3, 1  ;;  %v2080_v13 = vsel %vm2076_vm7, %v2047_v49, %v4199_v27  ;;  %v2958_v27 = vcombine.low %v314_v48, %v4340_v38  ;;  %v1886_v59 = vsel %vm919_vm1, %v1884_v43, %v1885_v6  ;;  %v3529_v39 = vld [vmem:[%s3771_s7 + $0xb0] ss:$0 sps:$4 sm:$0x33]  }
  0xc8   : > { %v4284_v57 = vpop.permute.xlu0 %1722  ;;  %v3164_v61 = vcombine.low %v2924_v54, %v4249_v30  ;;  %v1862_v3 = vsel %vm919_vm1, %v1860_v53, %v1861_v56  ;;  %v762_v5 = vrot.slane %v3519_v35, 1  ;;  %v2960_v63 = vcombine.low %v316_v12, %v4386_v10  ;;  %v2751_v12 = vld [vmem:[%s3771_s7 + $0x64] sm:$0xf] }
  0xc9   : > { %1568 = vrot.lane.b32.xlu1 %v3102_v26, %s3681_s24  ;;  %v1712_v26 = vrot.slane %v3507_v60, 1  ;;  %v1689_v55 = vsel %vm742_vm0, %v1687_v28, %v1688_v4  ;;  %v761_v37 = vrot.slane %v2958_v27, 1  ;;  %v3527_v28 = vld [vmem:[%s3771_s7 + $0x5c] ss:$0 sps:$4 sm:$0x11]   ;;  %v2990_v49 = vcombine.low %v346_v31, %v4340_v38 }
  0xca   : > { %1552 = vrot.lane.b32.xlu0 %v3094_v47, %s3681_s24  ;;  %v2096_v47 = vsel %vm2076_vm7, %v2063_v24, %v4194_v16  ;;  %v2974_v16 = vcombine.low %v330_v34, %v4323_v32  ;;  %v789_v24 = vrot.slane %v3525_v46, 1  ;;  %v764_v6 = vrot.slane %v2960_v63, 1  ;;  %v3535_v27 = vld [vmem:[%s3771_s7 + $0x5c] ss:$0 sps:$4 sm:$0x33]  }
  0xcb   : > { %v1913_v2 = vpop.permute.xlu1 %1912  ;;  %v2129_v29 = vsel %vm2109_vm8, %v2096_v47, %v4218_v52  ;;  %v1713_v17 = vsel %vm742_vm0, %v1711_v22, %v1712_v26  ;;  %v2113_v52 = vsel %vm2109_vm8, %v2080_v13, %v4225_v1  ;;  %v2908_v1 = vld [vmem:[%s3771_s7 + $0x6c] sm:$0xc]  ;;  %v1864_v26 = vrot.slane %v3523_v8, 2  ;;  %v364_v47 = vld [vmem:[%s3771_s7 + $0xb4] sm:$0xc] }
  0xcc   : > { %v2193_v7 = vsel %vm2175_vm10, %v2160_v62, %v1913_v2  ;;  %v1897_v14 = vpop.permute.xlu0 %1896  ;;  %v2162_v50 = vsel %vm2142_vm9, %v2129_v29, %v4264_v44  ;;  %v2146_v44 = vsel %vm2142_vm9, %v2113_v52, %v4284_v57  ;;  %v785_v60 = vrot.slane %v2974_v16, 1  ;;  %v3521_v62 = vld [vmem:[%s3771_s7 + $0xd4] ss:$0 sps:$4 sm:$0x33]   ;;  %v4376_v2 = vld [vmem:[%s3771_s7 + $0xb8] sm:$0xf] }
  0xcd   : > { %1570 = vrot.lane.b32.xlu1 %v3103_v33, %s3681_s24  ;;  %3246 = vmatprep.mubr.msk.bf16.mxu1 %vm2244_vm11, %v2193_v7  ;;  %v2177_v19 = vsel %vm2175_vm10, %v2144_v11, %v1897_v14  ;;  %v3148_v7 = vcombine.low %v2908_v1, %v4268_v45  ;;  %v1887_v11 = vrot.slane %v3164_v61, 2  ;;  %v1888_v14 = vrot.slane %v3521_v62, 2  ;;  %v3531_v29 = vld [vmem:[%s3771_s7 + $0x50] ss:$0 sps:$4 sm:$0x33]  }
  0xce   : > { %1554 = vrot.lane.b32.xlu0 %v3095_v41, %s3681_s24  ;;  %3230 = vmatprep.mubr.msk.bf16.mxu0 %vm2244_vm11, %v2177_v19  ;;  %v332_v41 = vld [vmem:[%s3771_s7 + $0xb4] sm:$0xe]  ;;  %v787_v9 = vsel %vm742_vm0, %v785_v60, %v786_v0  ;;  %v362_v19 = vld [vmem:[%s3771_s7 + $0xa8] sm:$0xc]  ;;  %v765_v48 = vrot.slane %v3527_v28, 1  ;;  %v938_v52 = vrot.slane %v2990_v49, 2 }
  0xcf   : > { %v4319_v23 = vpop.permute.xlu1 %811  ;;  %v2976_v15 = vcombine.low %v332_v41, %v4376_v2  ;;  %v1863_v22 = vrot.slane %v3148_v7, 2  ;;  %v1889_v34 = vsel %vm919_vm1, %v1887_v11, %v1888_v14  ;;  %v348_v16 = vld [vmem:[%s3771_s7 + $0x54] sm:$0xc]  ;;  %v942_v0 = vrot.slane %v3535_v27, 2  ;;  %v2766_v41 = vld [vmem:[%s3771_s7 + $0xc0] sm:$0xf] }
  0xd0   : > { %v4336_v18 = vpop.permute.xlu0 %795  ;;  %v766_v54 = vsel %vm742_vm0, %v764_v6, %v765_v48  ;;  %v2992_v56 = vcombine.low %v348_v16, %v4386_v10  ;;  %v2750_v8 = vld [vmem:[%s3771_s7 + $0x60] sm:$0xf]  ;;  %v2768_v14 = vld [vmem:[%s3771_s7 + $0xcc] sm:$0xf]  ;;  %v4453_v46 = vld [vmem:[%s3771_s7 + $0xd0] sm:$0xf] }
  0xd1   : > { %1744 = vrot.lane.b32.xlu1 %v1710_v20, %s3682_s6  ;;  %v763_v20 = vsel %vm742_vm0, %v761_v37, %v762_v5  ;;  %v788_v36 = vrot.slane %v2976_v15, 1  ;;  %v1865_v43 = vsel %vm919_vm1, %v1863_v22, %v1864_v26  ;;  %v2798_v5 = vld [vmem:[%s3771_s7 + $0xc0] sm:$0xe]  ;;  %v3016_v26 = vcombine.low %v2750_v8, %v2751_v12  ;;  %v2752_v63 = vld [vmem:[%s3771_s7 + $0x6c] sm:$0xf] }
  0xd2   : > { %1728 = vrot.lane.b32.xlu0 %v1686_v40, %s3682_s6  ;;  %v3006_v40 = vcombine.low %v362_v19, %v4323_v32  ;;  %v941_v60 = vrot.slane %v2992_v56, 2  ;;  %v2782_v15 = vld [vmem:[%s3771_s7 + $0x60] sm:$0xe]  ;;  %v2800_v28 = vld [vmem:[%s3771_s7 + $0xcc] sm:$0xe] }
  0xd3   : > { %v1915_v51 = vpop.permute.xlu1 %1914  ;;  %v790_v25 = vsel %vm742_vm0, %v788_v36, %v789_v24  ;;  %v2753_v31 = vld [vmem:[%s3771_s7 + $0x70] sm:$0xf]  ;;  %v3543_v36 = vld [vmem:[%s3771_s7 + $0x68] ss:$0 sps:$4 sm:$0x11]   ;;  %v3056_v6 = vcombine.low %v2800_v28, %v4453_v46 }
  0xd4   : > { %v2195_v33 = vsel %vm2175_vm10, %v2162_v50, %v1915_v51  ;;  %v1899_v58 = vpop.permute.xlu0 %1898  ;;  %v962_v13 = vrot.slane %v3006_v40, 2  ;;  %v963_v50 = vrot.slane %v3529_v39, 2  ;;  %v3008_v51 = vcombine.low %v364_v47, %v4376_v2  ;;  %v2784_v39 = vld [vmem:[%s3771_s7 + $0x6c] sm:$0xe]  ;;  %v2830_v16 = vld [vmem:[%s3771_s7 + $0xc0] sm:$0xc] }
  0xd5   : > { %1746 = vrot.lane.b32.xlu1 %v1713_v17, %s3682_s6  ;;  %3247 = vmatmul.mubr.msk.bf16.vlgmr.msra.gmra.mrb[0].mxu1 %vm2244_vm11, %v2195_v33  ;;  %v2179_v21 = vsel %vm2175_vm10, %v2146_v44, %v1899_v58  ;;  %v939_v33 = vrot.slane %v3531_v29, 2  ;;  %v943_v7 = vsel %vm919_vm1, %v941_v60, %v942_v0  ;;  %v3025_v40 = vcombine.low %v2768_v14, %v4453_v46  ;;  %v3545_v48 = vld [vmem:[%s3771_s7 + $0xd4] ss:$0 sps:$4 sm:$0x11]  }
  0xd6   : > { %1730 = vrot.lane.b32.xlu0 %v1689_v55, %s3682_s6  ;;  %3231 = vmatmul.mubr.msk.bf16.vlgmr.msra.gmra.mrb[0].mxu0 %vm2244_vm11, %v2179_v21  ;;  %v3533_v55 = vld [vmem:[%s3771_s7 + $0xbc] ss:$0 sps:$4 sm:$0x33]   ;;  %v964_v44 = vsel %vm919_vm1, %v962_v13, %v963_v50  ;;  %v965_v58 = vrot.slane %v3008_v51, 2  ;;  %v3017_v29 = vcombine.low %v2752_v63, %v2753_v31  ;;  %v1227_v13 = vrot.slane %v3543_v36, 1 }
  0xd7   : > { %v4373_v57 = vpop.permute.xlu1 %813  ;;  %v940_v21 = vsel %vm919_vm1, %v938_v52, %v939_v33  ;;  %v3040_v50 = vcombine.low %v2784_v39, %v2753_v31  ;;  %v3547_v51 = vld [vmem:[%s3771_s7 + $0x74] ss:$0 sps:$4 sm:$0x11]   ;;  %v1253_v33 = vrot.slane %v3056_v6, 1  ;;  %v1254_v56 = vrot.slane %v3545_v48, 1 }
  0xd8   : > { %v4382_v30 = vpop.permute.xlu0 %797  ;;  %v1230_v0 = vrot.slane %v3547_v51, 1  ;;  %v3555_v28 = vld [vmem:[%s3771_s7 + $0x74] ss:$0 sps:$4 sm:$0x33]   ;;  %v290_v36 = vld [vmem:[%s3771_s7 + $0x78] sm:$0xf] }
  0xd9   : > { %1920 = vrot.lane.b32.xlu1 %v1886_v59, %s3683_s13  ;;  %v966_v59 = vrot.slane %v3533_v55, 2  ;;  %v1229_v60 = vrot.slane %v3040_v50, 1  ;;  %v1406_v48 = vrot.slane %v3555_v28, 2  ;;  %v2862_v50 = vld [vmem:[%s3771_s7 + $0xd8] sm:$0xf] }
  0xda   : > { %1904 = vrot.lane.b32.xlu0 %v1862_v3, %s3683_s13  ;;  %v2767_v3 = vld [vmem:[%s3771_s7 + $0xc4] sm:$0xf]  ;;  %v4516_v51 = vld [vmem:[%s3771_s7 + $0xdc] sm:$0xf] }
  0xdb   : > { %v4393_v45 = vpop.permute.xlu1 %988  ;;  %v967_v62 = vsel %vm919_vm1, %v965_v58, %v966_v59  ;;  %v3024_v11 = vcombine.low %v2766_v41, %v2767_v3  ;;  %v3054_v19 = vcombine.low %v2798_v5, %v2767_v3  ;;  %v3086_v27 = vcombine.low %v2830_v16, %v2767_v3  ;;  %v2832_v59 = vld [vmem:[%s3771_s7 + $0xcc] sm:$0xc]  ;;  %v3551_v41 = vld [vmem:[%s3771_s7 + $0x68] ss:$0 sps:$4 sm:$0x33]  }
  0xdc   : > { %v4399_v4 = vpop.permute.xlu0 %972  ;;  %v2816_v3 = vld [vmem:[%s3771_s7 + $0x6c] sm:$0xc]  ;;  %v3088_v14 = vcombine.low %v2832_v59, %v4453_v46  ;;  %v2846_v59 = vld [vmem:[%s3771_s7 + $0x78] sm:$0xf] }
  0xdd   : > { %819 = vrot.lane.b32.xlu1 %v787_v9, %s3676_s8  ;;  %v1250_v47 = vrot.slane %v3054_v19, 1  ;;  %v1426_v8 = vrot.slane %v3086_v27, 2  ;;  %v3072_v63 = vcombine.low %v2816_v3, %v2753_v31  ;;  %v274_v31 = vld [vmem:[%s3771_s7 + $0x18] sm:$0xf]  ;;  %v3104_v3 = vcombine.low %v2862_v50, %v4516_v51 }
  0xde   : > { %803 = vrot.lane.b32.xlu0 %v763_v20, %s3676_s8  ;;  %v3541_v20 = vld [vmem:[%s3771_s7 + $0xc8] ss:$0 sps:$4 sm:$0x11]  }
  0xdf   : > { %v4407_v42 = vpop.permute.xlu1 %990  ;;  %v1405_v6 = vrot.slane %v3072_v63, 2 }
  0xe0   : > { %v4413_v17 = vpop.permute.xlu0 %974 }
  0xe1   : > { %1922 = vrot.lane.b32.xlu1 %v1889_v34, %s3683_s13  ;;  %v3038_v34 = vcombine.low %v2782_v15, %v2751_v12  ;;  %v3553_v15 = vld [vmem:[%s3771_s7 + $0xd4] ss:$0 sps:$4 sm:$0x33]  }
  0xe2   : > { %1906 = vrot.lane.b32.xlu0 %v1865_v43, %s3683_s13  ;;  %v1251_v43 = vrot.slane %v3541_v20, 1  ;;  %v1430_v39 = vrot.slane %v3553_v15, 2 }
  0xe3   : > { %v4421_v53 = vpop.permute.xlu1 %1100 }
  0xe4   : > { %v4426_v35 = vpop.permute.xlu0 %1084  ;;  %v1252_v52 = vsel %vm742_vm0, %v1250_v47, %v1251_v43 }
  0xe5   : > { %821 = vrot.lane.b32.xlu1 %v790_v25, %s3676_s8  ;;  %v1226_v25 = vrot.slane %v3038_v34, 1 }
  0xe6   : > { %805 = vrot.lane.b32.xlu0 %v766_v54, %s3676_s8  ;;  %v2814_v54 = vld [vmem:[%s3771_s7 + $0x60] sm:$0xc] }
  0xe7   : > { %v4431_v1 = vpop.permute.xlu1 %1102 }
  0xe8   : > { %v4434_v61 = vpop.permute.xlu0 %1086 }
  0xe9   : > { %996 = vrot.lane.b32.xlu1 %v964_v44, %s3677_s9  ;;  %v3549_v44 = vld [vmem:[%s3771_s7 + $0xc8] ss:$0 sps:$4 sm:$0x33]  }
  0xea   : > { %980 = vrot.lane.b32.xlu0 %v940_v21, %s3677_s9  ;;  %v1228_v21 = vsel %vm742_vm0, %v1226_v25, %v1227_v13 }
  0xeb   : > { %v4441_v37 = vpop.permute.xlu1 %1276 }
  0xec   : > { %v4447_v9 = vpop.permute.xlu0 %1260 }
  0xed   : > { %998 = vrot.lane.b32.xlu1 %v967_v62, %s3677_s9  ;;  %v3070_v62 = vcombine.low %v2814_v54, %v2751_v12  ;;  %v1231_v12 = vsel %vm742_vm0, %v1229_v60, %v1230_v0  ;;  %v2894_v54 = vld [vmem:[%s3771_s7 + $0xd8] sm:$0xe] }
  0xee   : > { %982 = vrot.lane.b32.xlu0 %v943_v7, %s3677_s9  ;;  %v1255_v7 = vsel %vm742_vm0, %v1253_v33, %v1254_v56  ;;  %v292_v56 = vld [vmem:[%s3771_s7 + $0x84] sm:$0xf]  ;;  %v2878_v60 = vld [vmem:[%s3771_s7 + $0x78] sm:$0xe]  ;;  %s3602_s9 = scalar_lea.vmem %s3601_s21, 8192 }
  0xef   : > { %v4457_v22 = vpop.permute.xlu1 %1278  ;;  %v1402_v20 = vrot.slane %v3070_v62, 2  ;;  %v4531_v62 = vld [vmem:[%s3771_s7 + $0x24] sm:$0xf] }
  0xf0   : > { %v4463_v24 = vpop.permute.xlu0 %1262 }
  0xf1   : > { %1108 = vrot.lane.b32.xlu1 %v3024_v11, %s3678_s10  ;;  %v1427_v11 = vrot.slane %v3549_v44, 2  ;;  %v1407_v44 = vsel %vm919_vm1, %v1405_v6, %v1406_v48  ;;  %v3565_v6 = vld [vmem:[%s3771_s7 + $0x80] ss:$0 sps:$4 sm:$0x11]  }
  0xf2   : > { %1092 = vrot.lane.b32.xlu0 %v3016_v26, %s3678_s10  ;;  %v1403_v26 = vrot.slane %v3551_v41, 2 }
  0xf3   : > { %v4471_v49 = vpop.permute.xlu1 %1452  ;;  %v1428_v46 = vsel %vm919_vm1, %v1426_v8, %v1427_v11  ;;  %v3134_v8 = vcombine.low %v2894_v54, %v4516_v51  ;;  %v2896_v11 = vld [vmem:[%s3771_s7 + $0xe4] sm:$0xe] }
  0xf4   : > { %v4475_v55 = vpop.permute.xlu0 %1436  ;;  %v1404_v43 = vsel %vm919_vm1, %v1402_v20, %v1403_v26  ;;  %v3563_v20 = vld [vmem:[%s3771_s7 + $0xe0] ss:$0 sps:$4 sm:$0x11]  }
  0xf5   : > { %1110 = vrot.lane.b32.xlu1 %v3025_v40, %s3678_s10  ;;  %v1429_v40 = vrot.slane %v3088_v14, 2  ;;  %v3590_v14 = vld [vmem:[%s3771_s7 + $0x88] sm:$0xf]  ;;  %v1714_v50 = vrot.slane %v3134_v8, 1  ;;  %v2910_v8 = vld [vmem:[%s3771_s7 + $0x78] sm:$0xc] }
  0xf6   : > { %1094 = vrot.lane.b32.xlu0 %v3017_v29, %s3678_s10  ;;  %v3588_v29 = vld [vmem:[%s3771_s7 + $0x7c] sm:$0xf]  ;;  %v2941_v15 = vcombine.low %v292_v56, %v3590_v14 }
  0xf7   : > { %v4482_v58 = vpop.permute.xlu1 %1454  ;;  %v2940_v16 = vcombine.low %v290_v36, %v3588_v29  ;;  %v1431_v13 = vsel %vm919_vm1, %v1429_v40, %v1430_v39  ;;  %v2880_v40 = vld [vmem:[%s3771_s7 + $0x84] sm:$0xe]  ;;  %v3591_v39 = vld [vmem:[%s3771_s7 + $0x28] sm:$0xf] }
  0xf8   : > { %v4487_v5 = vpop.permute.xlu0 %1438 }
  0xf9   : > { %1284 = vrot.lane.b32.xlu1 %v1252_v52, %s3679_s11  ;;  %v3589_v52 = vld [vmem:[%s3771_s7 + $0x1c] sm:$0xf]  ;;  %v1961_v0 = vsel %vm1928_vm3, %v2940_v16, %v4319_v23 }
  0xfa   : > { %1268 = vrot.lane.b32.xlu0 %v1228_v21, %s3679_s11  ;;  %v2932_v33 = vcombine.low %v274_v31, %v3589_v52  ;;  %v4525_v21 = vld [vmem:[%s3771_s7 + $0x7c] sm:$0xf]  ;;  %v1999_v23 = vsel %vm1977_vm4, %v1961_v0, %v4393_v45  ;;  %v2933_v31 = vcombine.low %v4531_v62, %v3591_v39 }
  0xfb   : > { %v4495_v19 = vpop.permute.xlu1 %1564  ;;  %v2032_v63 = vsel %vm2010_vm5, %v1999_v23, %v4421_v53  ;;  %v3096_v36 = vcombine.low %v2846_v59, %v4525_v21  ;;  %v3118_v45 = vcombine.low %v2878_v60, %v4525_v21 }
  0xfc   : > { %v4499_v34 = vpop.permute.xlu0 %1548  ;;  %v1937_v26 = vsel %vm1928_vm3, %v2932_v33, %v4336_v18  ;;  %v2065_v53 = vsel %vm2043_vm6, %v2032_v63, %v4441_v37  ;;  %v3567_v37 = vld [vmem:[%s3771_s7 + $0xec] ss:$0 sps:$4 sm:$0x11]  }
  0xfd   : > { %1286 = vrot.lane.b32.xlu1 %v1255_v7, %s3679_s11  ;;  %v2864_v7 = vld [vmem:[%s3771_s7 + $0xe4] sm:$0xf]  ;;  %v1983_v18 = vsel %vm1977_vm4, %v1937_v26, %v4399_v4  ;;  %v2098_v16 = vsel %vm2076_vm7, %v2065_v53, %v4471_v49  ;;  %v2926_v49 = vld [vmem:[%s3771_s7 + $0xd8] sm:$0xc]  ;;  %v1690_v0 = vrot.slane %v3118_v45, 1  ;;  %v1718_v14 = vrot.slane %v3567_v37, 1 }
  0xfe   : > { %1270 = vrot.lane.b32.xlu0 %v1231_v12, %s3679_s11  ;;  %v4542_v12 = vld [vmem:[%s3771_s7 + $0xe8] sm:$0xf]  ;;  %v2016_v29 = vsel %vm2010_vm5, %v1983_v18, %v4426_v35  ;;  %v2131_v52 = vsel %vm2109_vm8, %v2098_v16, %v4495_v19  ;;  %v1715_v35 = vrot.slane %v3563_v20, 1 }
  0xff   : > { %v4505_v47 = vpop.permute.xlu1 %1566  ;;  %v3136_v48 = vcombine.low %v2896_v11, %v4542_v12  ;;  %v3105_v4 = vcombine.low %v2864_v7, %v4542_v12  ;;  %v2049_v54 = vsel %vm2043_vm6, %v2016_v29, %v4447_v9  ;;  %v3569_v9 = vld [vmem:[%s3771_s7 + $0x8c] ss:$0 sps:$4 sm:$0x11]  }
 0x100   : > { %v4510_v25 = vpop.permute.xlu0 %1550  ;;  %v2082_v56 = vsel %vm2076_vm7, %v2049_v54, %v4475_v55  ;;  %v1964_v55 = vsel %vm1928_vm3, %v2941_v15, %v4373_v57  ;;  %v1716_v26 = vsel %vm742_vm0, %v1714_v50, %v1715_v35  ;;  %v3573_v15 = vld [vmem:[%s3771_s7 + $0xe0] ss:$0 sps:$4 sm:$0x33]   ;;  %v3577_v29 = vld [vmem:[%s3771_s7 + $0xec] ss:$0 sps:$4 sm:$0x33]  }
 0x101   : > { %1460 = vrot.lane.b32.xlu1 %v1428_v46, %s3680_s12  ;;  %v2848_v46 = vld [vmem:[%s3771_s7 + $0x84] sm:$0xf]  ;;  %v2115_v62 = vsel %vm2109_vm8, %v2082_v56, %v4499_v34  ;;  %v1717_v7 = vrot.slane %v3136_v48, 1  ;;  %v3166_v34 = vcombine.low %v2926_v49, %v4516_v51  ;;  %v2001_v23 = vsel %vm1977_vm4, %v1964_v55, %v4407_v42 }
 0x102   : > { %1444 = vrot.lane.b32.xlu0 %v1404_v43, %s3680_s12  ;;  %v4563_v43 = vld [vmem:[%s3771_s7 + $0x88] sm:$0xf]  ;;  %v2034_v63 = vsel %vm2010_vm5, %v2001_v23, %v4431_v1  ;;  %v1694_v42 = vrot.slane %v3569_v9, 1  ;;  %v1891_v48 = vrot.slane %v3573_v15, 2 }
 0x103   : > { %v1741_v27 = vpop.permute.xlu1 %1740  ;;  %v3120_v33 = vcombine.low %v2880_v40, %v4563_v43  ;;  %v3097_v60 = vcombine.low %v2848_v46, %v4563_v43  ;;  %v2928_v46 = vld [vmem:[%s3771_s7 + $0xe4] sm:$0xc]  ;;  %v3575_v40 = vld [vmem:[%s3771_s7 + $0x80] ss:$0 sps:$4 sm:$0x33]   ;;  %v1890_v53 = vrot.slane %v3166_v34, 2 }
 0x104   : > { %v1725_v41 = vpop.permute.xlu0 %1724  ;;  %v1867_v54 = vrot.slane %v3575_v40, 2  ;;  %v3593_v40 = vld [vmem:[%s3771_s7 + $0x34] sm:$0xf] }
 0x105   : > { %1462 = vrot.lane.b32.xlu1 %v1431_v13, %s3680_s12  ;;  %v1693_v57 = vrot.slane %v3120_v33, 1  ;;  %v1892_v33 = vsel %vm919_vm1, %v1890_v53, %v1891_v48 }
 0x106   : > { %1446 = vrot.lane.b32.xlu0 %v1407_v44, %s3680_s12  ;;  %v2164_v44 = vsel %vm2142_vm9, %v2131_v52, %v1741_v27  ;;  %v2148_v27 = vsel %vm2142_vm9, %v2115_v62, %v1725_v41  ;;  %v1940_v41 = vsel %vm1928_vm3, %v2933_v31, %v4382_v30  ;;  %v2067_v30 = vsel %vm2043_vm6, %v2034_v63, %v4457_v22  ;;  %v3579_v52 = vld [vmem:[%s3771_s7 + $0x8c] ss:$0 sps:$4 sm:$0x33]  }
 0x107   : > { %v4550_v28 = vpop.permute.xlu1 %1742  ;;  %v1985_v45 = vsel %vm1977_vm4, %v1940_v41, %v4413_v17  ;;  %v2100_v31 = vsel %vm2076_vm7, %v2067_v30, %v4482_v58  ;;  %v2912_v17 = vld [vmem:[%s3771_s7 + $0x84] sm:$0xc]  ;;  %v1695_v50 = vsel %vm742_vm0, %v1693_v57, %v1694_v42  ;;  %v294_v42 = vld [vmem:[%s3771_s7 + $0x90] sm:$0xf] }
 0x108   : > { %v4571_v13 = vpop.permute.xlu0 %1726  ;;  %v2018_v39 = vsel %vm2010_vm5, %v1985_v45, %v4434_v61  ;;  %v3168_v61 = vcombine.low %v2928_v46, %v4542_v12  ;;  %v3152_v12 = vcombine.low %v2912_v17, %v4563_v43  ;;  %v278_v46 = vld [vmem:[%s3771_s7 + $0x30] sm:$0xf]  ;;  %v3592_v45 = vld [vmem:[%s3771_s7 + $0x94] sm:$0xf]  ;;  %v296_v17 = vld [vmem:[%s3771_s7 + $0x9c] sm:$0xf] }
 0x109   : > { %1572 = vrot.lane.b32.xlu1 %v3104_v3, %s3681_s24  ;;  %v1691_v3 = vrot.slane %v3565_v6, 1  ;;  %v2051_v22 = vsel %vm2043_vm6, %v2018_v39, %v4463_v24  ;;  %v2133_v6 = vsel %vm2109_vm8, %v2100_v31, %v4505_v47  ;;  %v2942_v30 = vcombine.low %v294_v42, %v3592_v45 }
 0x10a   : > { %1556 = vrot.lane.b32.xlu0 %v3096_v36, %s3681_s24  ;;  %v3150_v36 = vcombine.low %v2910_v8, %v4525_v21  ;;  %v1719_v21 = vsel %vm742_vm0, %v1717_v7, %v1718_v14  ;;  %v2084_v58 = vsel %vm2076_vm7, %v2051_v22, %v4487_v5  ;;  %v2166_v16 = vsel %vm2142_vm9, %v2133_v6, %v4550_v28 }
 0x10b   : > { %v1917_v59 = vpop.permute.xlu1 %1916  ;;  %v1692_v1 = vsel %vm742_vm0, %v1690_v0, %v1691_v3  ;;  %v2117_v24 = vsel %vm2109_vm8, %v2084_v58, %v4510_v25  ;;  %v1893_v49 = vrot.slane %v3168_v61, 2  ;;  %v1894_v25 = vrot.slane %v3577_v29, 2  ;;  %v280_v29 = vld [vmem:[%s3771_s7 + $0x3c] sm:$0xf] }
 0x10c   : > { %v2197_v19 = vsel %vm2175_vm10, %v2164_v44, %v1917_v59  ;;  %v1901_v11 = vpop.permute.xlu0 %1900  ;;  %v1866_v37 = vrot.slane %v3150_v36, 2  ;;  %v2150_v5 = vsel %vm2142_vm9, %v2117_v24, %v4571_v13  ;;  %v1869_v13 = vrot.slane %v3152_v12, 2 }
 0x10d   : > { %1574 = vrot.lane.b32.xlu1 %v3105_v4, %s3681_s24  ;;  %3250 = vmatprep.mubr.msk.bf16.mxu1 %vm2244_vm11, %v2197_v19  ;;  %v2181_v20 = vsel %vm2175_vm10, %v2148_v27, %v1901_v11  ;;  %v1870_v44 = vrot.slane %v3579_v52, 2  ;;  %v2934_v39 = vcombine.low %v278_v46, %v3593_v40 }
 0x10e   : > { %1558 = vrot.lane.b32.xlu0 %v3097_v60, %s3681_s24  ;;  %3234 = vmatprep.mubr.msk.bf16.mxu0 %vm2244_vm11, %v2181_v20  ;;  %v1868_v56 = vsel %vm919_vm1, %v1866_v37, %v1867_v54  ;;  %v1895_v60 = vsel %vm919_vm1, %v1893_v49, %v1894_v25 }
 0x10f   : > { %v4609_v51 = vpop.permute.xlu1 %815  ;;  %v1871_v9 = vsel %vm919_vm1, %v1869_v13, %v1870_v44 }
 0x110   : > { %v4623_v18 = vpop.permute.xlu0 %799 }
 0x111   : > { %1748 = vrot.lane.b32.xlu1 %v1716_v26, %s3682_s6  ;;  %v1943_v6 = vsel %vm1928_vm3, %v2934_v39, %v4623_v18  ;;  %v3595_v18 = vld [vmem:[%s3771_s7 + $0x40] sm:$0xf] }
 0x112   : > { %1732 = vrot.lane.b32.xlu0 %v1692_v1, %s3682_s6  ;;  %v2935_v12 = vcombine.low %v280_v29, %v3595_v18  ;;  %v298_v29 = vld [vmem:[%s3771_s7 + $0xa8] sm:$0xf] }
 0x113   : > { %v1919_v4 = vpop.permute.xlu1 %1918 }
 0x114   : > { %v2199_v47 = vsel %vm2175_vm10, %v2166_v16, %v1919_v4  ;;  %v1903_v35 = vpop.permute.xlu0 %1902  ;;  %v3594_v4 = vld [vmem:[%s3771_s7 + $0xa0] sm:$0xf] }
 0x115   : > { %1750 = vrot.lane.b32.xlu1 %v1719_v21, %s3682_s6  ;;  %3251 = vmatmul.mubr.msk.bf16.gmra.mrb[4].mxu1 %vm2244_vm11, %v2199_v47  ;;  %v2183_v28 = vsel %vm2175_vm10, %v2150_v5, %v1903_v35  ;;  %v1967_v21 = vsel %vm1928_vm3, %v2942_v30, %v4609_v51 }
 0x116   : > { %1734 = vrot.lane.b32.xlu0 %v1695_v50, %s3682_s6  ;;  %3235 = vmatmul.mubr.msk.bf16.gmra.mrb[4].mxu0 %vm2244_vm11, %v2183_v28  ;;  %v2943_v50 = vcombine.low %v296_v17, %v3594_v4  ;;  %v2944_v4 = vcombine.low %v298_v29, %v4323_v32 }
 0x117   : > { %v4653_v43 = vpop.permute.xlu1 %817 }
 0x118   : > { %v4656_v59 = vpop.permute.xlu0 %801  ;;  %v1970_v49 = vsel %vm1928_vm3, %v2943_v50, %v4653_v43 }
 0x119   : > { %1924 = vrot.lane.b32.xlu1 %v1892_v33, %s3683_s13 }
 0x11a   : > { %1908 = vrot.lane.b32.xlu0 %v1868_v56, %s3683_s13 }
 0x11b   : > { %v993_v0 = vpop.permute.xlu1 %992 }
 0x11c   : > { %v977_v62 = vpop.permute.xlu0 %976  ;;  %v2003_v22 = vsel %vm1977_vm4, %v1967_v21, %v993_v0 }
 0x11d   : > { %1926 = vrot.lane.b32.xlu1 %v1895_v60, %s3683_s13  ;;  %v1987_v58 = vsel %vm1977_vm4, %v1943_v6, %v977_v62  ;;  %v1946_v60 = vsel %vm1928_vm3, %v2935_v12, %v4656_v59 }
 0x11e   : > { %1910 = vrot.lane.b32.xlu0 %v1871_v9, %s3683_s13 }
 0x11f   : > { %v995_v19 = vpop.permute.xlu1 %994 }
 0x120   : > { %v979_v3 = vpop.permute.xlu0 %978  ;;  %v2005_v13 = vsel %vm1977_vm4, %v1970_v49, %v995_v19 }
 0x121   : > { %v1989_v62 = vsel %vm1977_vm4, %v1946_v60, %v979_v3 }
 0x123   : > { %v1105_v7 = vpop.permute.xlu1 %1104 }
 0x124   : > { %v1089_v8 = vpop.permute.xlu0 %1088  ;;  %v2036_v48 = vsel %vm2010_vm5, %v2003_v22, %v1105_v7 }
 0x125   : > { %v2020_v51 = vsel %vm2010_vm5, %v1987_v58, %v1089_v8 }
 0x127   : > { %v1107_v55 = vpop.permute.xlu1 %1106 }
 0x128   : > { %v1091_v27 = vpop.permute.xlu0 %1090  ;;  %v2038_v0 = vsel %vm2010_vm5, %v2005_v13, %v1107_v55 }
 0x129   : > { %v2022_v7 = vsel %vm2010_vm5, %v1989_v62, %v1091_v27 }
 0x12b   : > { %v1281_v11 = vpop.permute.xlu1 %1280 }
 0x12c   : > { %v1265_v14 = vpop.permute.xlu0 %1264  ;;  %v2069_v16 = vsel %vm2043_vm6, %v2036_v48, %v1281_v11 }
 0x12d   : > { %v2053_v47 = vsel %vm2043_vm6, %v2020_v51, %v1265_v14  ;;  %v300_v51 = vld [vmem:[%s3771_s7 + $0xb4] sm:$0xf] }
 0x12e   : > { %v2945_v18 = vcombine.low %v300_v51, %v4376_v2 }
 0x12f   : > { %v1283_v34 = vpop.permute.xlu1 %1282 }
 0x130   : > { %v1267_v23 = vpop.permute.xlu0 %1266  ;;  %v2071_v43 = vsel %vm2043_vm6, %v2038_v0, %v1283_v34 }
 0x131   : > { %v2055_v19 = vsel %vm2043_vm6, %v2022_v7, %v1267_v23 }
 0x133   : > { %v1457_v20 = vpop.permute.xlu1 %1456 }
 0x134   : > { %v1441_v26 = vpop.permute.xlu0 %1440  ;;  %v2102_v37 = vsel %vm2076_vm7, %v2069_v16, %v1457_v20  ;;  %v282_v16 = vld [vmem:[%s3771_s7 + $0x48] sm:$0xf] }
 0x135   : > { %v2086_v52 = vsel %vm2076_vm7, %v2053_v47, %v1441_v26  ;;  %v284_v47 = vld [vmem:[%s3771_s7 + $0x54] sm:$0xf]  ;;  %s246_s7 = sand.u32 1, %s3658_s16  }
 0x136   : > { %s2736_s22 = sshll.u32 %s246_s7, 8  ;;  %s4878_s6 = scalar_lea.sflag [#allocation3], %s246_s7 }
 0x137   : > { %v1459_v57 = vpop.permute.xlu1 %1458  ;;  %s4783_s24 = scalar_lea.vmem [#allocation2], %s2736_s22 }
 0x138   : > { %v1443_v15 = vpop.permute.xlu0 %1442  ;;  %v2104_v8 = vsel %vm2076_vm7, %v2071_v43, %v1459_v57  ;;  %s2602_s29 = sshll.u32 %s4783_s24, 4  ;;  %s4872_s29 = int_to_ptr.vmem [resolvable:$true] %s2602_s29 }
 0x139   : > { %v2088_v59 = vsel %vm2076_vm7, %v2055_v19, %v1443_v15  ;;  %s3596_s13 = scalar_lea.vmem %s4872_s29, 4096  ;;  %p3603_p1 = scmp.lt.s32.totalorder %s4872_s29, %s3601_s21 }
 0x13a   : > { %p3597_p12 = scmp.ne.s32.totalorder %s4872_s29, %s3596_s13  ;;  %p3604_p2 = scmp.lt.s32.totalorder %s3602_s9, %s3596_s13 }
 0x13b   : > { %v1569_v41 = vpop.permute.xlu1 %1568 }
 0x13c   : > { %v1553_v63 = vpop.permute.xlu0 %1552  ;;  %v2135_v54 = vsel %vm2109_vm8, %v2102_v37, %v1569_v41  ;;  %v2936_v37 = vcombine.low %v282_v16, %v4340_v38  ;;  %p3598_p13 = pnand %p3597_p12, %p3751_p4  ;;  %p3605_p3 = por %p3604_p2, %p3603_p1 }
 0x13d   : > { %v2119_v28 = vsel %vm2109_vm8, %v2086_v52, %v1553_v63 }
 0x13e   : > { %p3599_p0 = pneg %p3598_p13 }
 0x13f   : > { %v1571_v36 = vpop.permute.xlu1 %1570 }
 0x140   : > { %v1555_v1 = vpop.permute.xlu0 %1554  ;;  %v2137_v14 = vsel %vm2109_vm8, %v2104_v8, %v1571_v36  ;;  %p3606_p5 = pnand %p3605_p3, %p3599_p0 }
 0x141   : > { %v2121_v26 = vsel %vm2109_vm8, %v2088_v59, %v1555_v1 }
 0x143   : > { %v1745_v31 = vpop.permute.xlu1 %1744 }
 0x144   : > { %v1729_v53 = vpop.permute.xlu0 %1728  ;;  %v2168_v5 = vsel %vm2142_vm9, %v2135_v54, %v1745_v31 }
 0x145   : > { %v2152_v25 = vsel %vm2142_vm9, %v2119_v28, %v1729_v53 }
 0x147   : > { %v1747_v61 = vpop.permute.xlu1 %1746 }
 0x148   : > { %v1731_v24 = vpop.permute.xlu0 %1730  ;;  %v2170_v55 = vsel %vm2142_vm9, %v2137_v14, %v1747_v61 }
 0x149   : > { %v2154_v34 = vsel %vm2142_vm9, %v2121_v26, %v1731_v24 }
 0x14b   : > { %v1921_v35 = vpop.permute.xlu1 %1920 }
 0x14c   : > { %v2201_v33 = vsel %vm2175_vm10, %v2168_v5, %v1921_v35  ;;  %v1905_v56 = vpop.permute.xlu0 %1904  ;;  %v2937_v35 = vcombine.low %v284_v47, %v4386_v10 }
 0x14d   : > { %3254 = vmatprep.mubr.msk.bf16.mxu1 %vm2244_vm11, %v2201_v33  ;;  %v2185_v44 = vsel %vm2175_vm10, %v2152_v25, %v1905_v56 }
 0x14e   : > { %3238 = vmatprep.mubr.msk.bf16.mxu0 %vm2244_vm11, %v2185_v44 }
 0x14f   : > { %v820_v9 = vpop.permute.xlu1 %819 }
 0x150   : > { %v804_v11 = vpop.permute.xlu0 %803  ;;  %v1973_v54 = vsel %vm1928_vm3, %v2944_v4, %v820_v9 }
 0x151   : > { %v1949_v5 = vsel %vm1928_vm3, %v2936_v37, %v804_v11 }
 0x153   : > { %v1923_v20 = vpop.permute.xlu1 %1922 }
 0x154   : > { %v2203_v3 = vsel %vm2175_vm10, %v2170_v55, %v1923_v20  ;;  %v1907_v41 = vpop.permute.xlu0 %1906 }
 0x155   : > { %3255 = vmatmul.mubr.msk.bf16.gmra.mrb[8].mxu1 %vm2244_vm11, %v2203_v3  ;;  %v2187_v27 = vsel %vm2175_vm10, %v2154_v34, %v1907_v41 }
 0x156   : > { %3239 = vmatmul.mubr.msk.bf16.gmra.mrb[8].mxu0 %vm2244_vm11, %v2187_v27 }
 0x157   : > { %v822_v23 = vpop.permute.xlu1 %821 }
 0x158   : > { %v806_v57 = vpop.permute.xlu0 %805  ;;  %v1976_v49 = vsel %vm1928_vm3, %v2945_v18, %v822_v23 }
 0x159   : > { %v1952_v60 = vsel %vm1928_vm3, %v2937_v35, %v806_v57 }
 0x15b   : > { %v997_v63 = vpop.permute.xlu1 %996 }
 0x15c   : > { %v981_v15 = vpop.permute.xlu0 %980  ;;  %v2007_v52 = vsel %vm1977_vm4, %v1973_v54, %v997_v63 }
 0x15d   : > { %v1991_v33 = vsel %vm1977_vm4, %v1949_v5, %v981_v15 }
 0x15f   : > { %v999_v42 = vpop.permute.xlu1 %998 }
 0x160   : > { %v983_v36 = vpop.permute.xlu0 %982  ;;  %v2009_v13 = vsel %vm1977_vm4, %v1976_v49, %v999_v42 }
 0x161   : > { %v1993_v7 = vsel %vm1977_vm4, %v1952_v60, %v983_v36 }
 0x163   : > { %v1109_v46 = vpop.permute.xlu1 %1108 }
 0x164   : > { %v1093_v45 = vpop.permute.xlu0 %1092  ;;  %v2040_v28 = vsel %vm2010_vm5, %v2007_v52, %v1109_v46  ;;  %v4760_v46 = vld [vmem:[%s4927_s2] ss:$0 sm:$0xff] }
 0x165   : > { %v2024_v25 = vsel %vm2010_vm5, %v1991_v33, %v1093_v45  ;;  %v4765_v45 = vld [vmem:[%s4928_s3] ss:$0 sm:$0xff] }
 0x167   : > { %v1111_v30 = vpop.permute.xlu1 %1110 }
 0x168   : > { %v1095_v1 = vpop.permute.xlu0 %1094  ;;  %v2042_v0 = vsel %vm2010_vm5, %v2009_v13, %v1111_v30 }
 0x169   : > { %v2026_v14 = vsel %vm2010_vm5, %v1993_v7, %v1095_v1 }
 0x16b   : > { %v1285_v40 = vpop.permute.xlu1 %1284 }
 0x16c   : > { %v1269_v39 = vpop.permute.xlu0 %1268  ;;  %v2073_v38 = vsel %vm2043_vm6, %v2040_v28, %v1285_v40 }
 0x16d   : > { %v2057_v44 = vsel %vm2043_vm6, %v2024_v25, %v1269_v39 }
 0x16f   : > { %v1287_v31 = vpop.permute.xlu1 %1286 }
 0x170   : > { %v1271_v21 = vpop.permute.xlu0 %1270  ;;  %v2075_v8 = vsel %vm2043_vm6, %v2042_v0, %v1287_v31 }
 0x171   : > { %v2059_v26 = vsel %vm2043_vm6, %v2026_v14, %v1271_v21 }
 0x173   : > { %v1461_v53 = vpop.permute.xlu1 %1460 }
 0x174   : > { %v1445_v17 = vpop.permute.xlu0 %1444  ;;  %v2106_v2 = vsel %vm2076_vm7, %v2073_v38, %v1461_v53 }
 0x175   : > { %v2090_v9 = vsel %vm2076_vm7, %v2057_v44, %v1445_v17 }
 0x177   : > { %v1463_v22 = vpop.permute.xlu1 %1462 }
 0x178   : > { %v1447_v6 = vpop.permute.xlu0 %1446  ;;  %v2108_v59 = vsel %vm2076_vm7, %v2075_v8, %v1463_v22 }
 0x179   : > { %v2092_v41 = vsel %vm2076_vm7, %v2059_v26, %v1447_v6 }
 0x17b   : > { %v1573_v48 = vpop.permute.xlu1 %1572 }
 0x17c   : > { %v1557_v61 = vpop.permute.xlu0 %1556  ;;  %v2139_v10 = vsel %vm2109_vm8, %v2106_v2, %v1573_v48 }
 0x17d   : > { %v2123_v11 = vsel %vm2109_vm8, %v2090_v9, %v1557_v61 }
 0x17f   : > { %v1575_v58 = vpop.permute.xlu1 %1574 }
 0x180   : > { %v1559_v50 = vpop.permute.xlu0 %1558  ;;  %v2141_v3 = vsel %vm2109_vm8, %v2108_v59, %v1575_v58 }
 0x181   : > { %v2125_v57 = vsel %vm2109_vm8, %v2092_v41, %v1559_v50 }
 0x183   : > { %v1749_v24 = vpop.permute.xlu1 %1748 }
 0x184   : > { %v1733_v12 = vpop.permute.xlu0 %1732  ;;  %v2172_v62 = vsel %vm2142_vm9, %v2139_v10, %v1749_v24 }
 0x185   : > { %v2156_v55 = vsel %vm2142_vm9, %v2123_v11, %v1733_v12 }
 0x187   : > { %v1751_v32 = vpop.permute.xlu1 %1750 }
 0x188   : > { %v1735_v56 = vpop.permute.xlu0 %1734  ;;  %v2174_v27 = vsel %vm2142_vm9, %v2141_v3, %v1751_v32 }
 0x189   : > { %v2158_v15 = vsel %vm2142_vm9, %v2125_v57, %v1735_v56 }
 0x18b   : > { %v1925_v43 = vpop.permute.xlu1 %1924 }
 0x18c   : > { %v2205_v19 = vsel %vm2175_vm10, %v2172_v62, %v1925_v43  ;;  %v1909_v20 = vpop.permute.xlu0 %1908 }
 0x18d   : > { %3258 = vmatprep.mubr.msk.bf16.mxu1 %vm2244_vm11, %v2205_v19  ;;  %v2189_v34 = vsel %vm2175_vm10, %v2156_v55, %v1909_v20 }
 0x18e   : > { %3242 = vmatprep.mubr.msk.bf16.mxu0 %vm2244_vm11, %v2189_v34 }
 0x18f   : > { %v1927_v23 = vpop.permute.xlu1 %1926 }
 0x190   : > { %v2207_v63 = vsel %vm2175_vm10, %v2174_v27, %v1927_v23  ;;  %v1911_v42 = vpop.permute.xlu0 %1910 }
 0x191   : > { %3259 = vmatmul.mubr.msk.bf16.gmra.mrb[12].mxu1 %vm2244_vm11, %v2207_v63  ;;  %v2191_v36 = vsel %vm2175_vm10, %v2158_v15, %v1911_v42 }
 0x192   : > { %3243 = vmatmul.mubr.msk.bf16.gmra.mrb[12].mxu0 %vm2244_vm11, %v2191_v36 }
 0x1a8   : > { %v3248_v30 = vpop.f32.mrb[0].mxu1 }
 0x1a9   : > { %v2467_v1 = vmul.f32 %v3248_v30, %v4760_v46  ;;  %v2379_v40 = vpop.f32.mrb[1].mxu1  ;;  %v3232_v39 = vpop.f32.mrb[0].mxu0 }
 0x1aa   : > { %v2465_v31 = vmul.f32 %v4760_v46, %v2379_v40  ;;  %v3249_v21 = vpop.f32.mrb[2].mxu1  ;;  %v2451_v53 = vmul.f32 %v3232_v39, %v4760_v46  ;;  %v2315_v22 = vpop.f32.mrb[1].mxu0 }
 0x1ab   : > { %v2506_v17 = vadd.f32 %v4765_v45, %v2467_v1  ;;  %v2468_v6 = vmul.f32 %v3249_v21, %v4760_v46  ;;  %v2382_v48 = vpop.f32.mrb[3].mxu1  ;;  %v2449_v61 = vmul.f32 %v4760_v46, %v2315_v22  ;;  %v3233_v58 = vpop.f32.mrb[2].mxu0 }
 0x1ac   : > { %v2504_v29 = vadd.f32 %v4765_v45, %v2465_v31  ;;  %v2466_v16 = vmul.f32 %v4760_v46, %v2382_v48  ;;  %v2490_v4 = vadd.f32 %v4765_v45, %v2451_v53  ;;  %v2452_v51 = vmul.f32 %v3233_v58, %v4760_v46  ;;  %v2318_v24 = vpop.f32.mrb[3].mxu0 }
 0x1ad   : > { %v2538_v50 = vmax.f32 %v2506_v17, 0.0  ;;  %v2507_v37 = vadd.f32 %v4765_v45, %v2468_v6  ;;  %v2488_v47 = vadd.f32 %v4765_v45, %v2449_v61  ;;  %v2450_v18 = vmul.f32 %v4760_v46, %v2318_v24 }
 0x1ae   : > { %v2536_v54 = vmax.f32 %v2504_v29, 0.0  ;;  %v2505_v12 = vadd.f32 %v4765_v45, %v2466_v16  ;;  %v2522_v52 = vmax.f32 %v2490_v4, 0.0  ;;  %v2491_v5 = vadd.f32 %v4765_v45, %v2452_v51 }
 0x1af   : > { %2570 = vst [vmem:[%s4783_s24 + $0x90] sm:$0xff] %v2538_v50  ;;  %v2539_v35 = vmax.f32 %v2507_v37, 0.0  ;;  %v2520_v28 = vmax.f32 %v2488_v47, 0.0  ;;  %v2489_v32 = vadd.f32 %v4765_v45, %v2450_v18 }
 0x1b0   : > { %2568 = vst [vmem:[%s4783_s24 + $0x80] sm:$0xff] %v2536_v54  ;;  %v2537_v33 = vmax.f32 %v2505_v12, 0.0  ;;  %2554 = vst [vmem:[%s4783_s24 + $0x10] sm:$0xff] %v2522_v52  ;;  %v2523_v38 = vmax.f32 %v2491_v5, 0.0 }
 0x1b1   : > { %2571 = vst [vmem:[%s4783_s24 + $0x98] sm:$0xff] %v2539_v35  ;;  %2552 = vst [vmem:[%s4783_s24] sm:$0xff] %v2520_v28  ;;  %v2521_v49 = vmax.f32 %v2489_v32, 0.0 }
 0x1b2   : > { %2569 = vst [vmem:[%s4783_s24 + $0x88] sm:$0xff] %v2537_v33  ;;  %2555 = vst [vmem:[%s4783_s24 + $0x18] sm:$0xff] %v2523_v38 }
 0x1b3   : > { %2553 = vst [vmem:[%s4783_s24 + $0x8] sm:$0xff] %v2521_v49 }
 0x1e8   : > { %v3252_v25 = vpop.f32.mrb[4].mxu1 }
 0x1e9   : > { %v2471_v2 = vmul.f32 %v3252_v25, %v4760_v46  ;;  %v2395_v56 = vpop.f32.mrb[5].mxu1  ;;  %v3236_v13 = vpop.f32.mrb[4].mxu0 }
 0x1ea   : > { %v2469_v44 = vmul.f32 %v4760_v46, %v2395_v56  ;;  %v3253_v10 = vpop.f32.mrb[6].mxu1  ;;  %v2455_v60 = vmul.f32 %v3236_v13, %v4760_v46  ;;  %v2331_v9 = vpop.f32.mrb[5].mxu0 }
 0x1eb   : > { %v2510_v0 = vadd.f32 %v4765_v45, %v2471_v2  ;;  %v2472_v62 = vmul.f32 %v3253_v10, %v4760_v46  ;;  %v2398_v43 = vpop.f32.mrb[7].mxu1  ;;  %v2453_v7 = vmul.f32 %v4760_v46, %v2331_v9  ;;  %v3237_v11 = vpop.f32.mrb[6].mxu0 }
 0x1ec   : > { %v2508_v8 = vadd.f32 %v4765_v45, %v2469_v44  ;;  %v2470_v19 = vmul.f32 %v4760_v46, %v2398_v43  ;;  %v2494_v14 = vadd.f32 %v4765_v45, %v2455_v60  ;;  %v2456_v55 = vmul.f32 %v3237_v11, %v4760_v46  ;;  %v2334_v26 = vpop.f32.mrb[7].mxu0 }
 0x1ed   : > { %v2542_v59 = vmax.f32 %v2510_v0, 0.0  ;;  %v2511_v20 = vadd.f32 %v4765_v45, %v2472_v62  ;;  %v2492_v3 = vadd.f32 %v4765_v45, %v2453_v7  ;;  %v2454_v41 = vmul.f32 %v4760_v46, %v2334_v26 }
 0x1ee   : > { %v2540_v34 = vmax.f32 %v2508_v8, 0.0  ;;  %v2509_v27 = vadd.f32 %v4765_v45, %v2470_v19  ;;  %v2526_v23 = vmax.f32 %v2494_v14, 0.0  ;;  %v2495_v57 = vadd.f32 %v4765_v45, %v2456_v55 }
 0x1ef   : > { %2574 = vst [vmem:[%s4783_s24 + $0xb0] sm:$0xff] %v2542_v59  ;;  %v2543_v63 = vmax.f32 %v2511_v20, 0.0  ;;  %v2524_v15 = vmax.f32 %v2492_v3, 0.0  ;;  %v2493_v42 = vadd.f32 %v4765_v45, %v2454_v41 }
 0x1f0   : > { %2572 = vst [vmem:[%s4783_s24 + $0xa0] sm:$0xff] %v2540_v34  ;;  %v2541_v36 = vmax.f32 %v2509_v27, 0.0  ;;  %2558 = vst [vmem:[%s4783_s24 + $0x30] sm:$0xff] %v2526_v23  ;;  %v2527_v30 = vmax.f32 %v2495_v57, 0.0 }
 0x1f1   : > { %2575 = vst [vmem:[%s4783_s24 + $0xb8] sm:$0xff] %v2543_v63  ;;  %2556 = vst [vmem:[%s4783_s24 + $0x20] sm:$0xff] %v2524_v15  ;;  %v2525_v1 = vmax.f32 %v2493_v42, 0.0 }
 0x1f2   : > { %2573 = vst [vmem:[%s4783_s24 + $0xa8] sm:$0xff] %v2541_v36  ;;  %2559 = vst [vmem:[%s4783_s24 + $0x38] sm:$0xff] %v2527_v30 }
 0x1f3   : > { %2557 = vst [vmem:[%s4783_s24 + $0x28] sm:$0xff] %v2525_v1 }
 0x228   : > { %v3256_v40 = vpop.f32.mrb[8].mxu1 }
 0x229   : > { %v2475_v39 = vmul.f32 %v3256_v40, %v4760_v46  ;;  %v2411_v31 = vpop.f32.mrb[9].mxu1  ;;  %v3240_v21 = vpop.f32.mrb[8].mxu0 }
 0x22a   : > { %v2473_v53 = vmul.f32 %v4760_v46, %v2411_v31  ;;  %v3257_v17 = vpop.f32.mrb[10].mxu1  ;;  %v2459_v22 = vmul.f32 %v3240_v21, %v4760_v46  ;;  %v2347_v48 = vpop.f32.mrb[9].mxu0 }
 0x22b   : > { %v2514_v6 = vadd.f32 %v4765_v45, %v2475_v39  ;;  %v2476_v61 = vmul.f32 %v3257_v17, %v4760_v46  ;;  %v2414_v29 = vpop.f32.mrb[11].mxu1  ;;  %v2457_v58 = vmul.f32 %v4760_v46, %v2347_v48  ;;  %v3241_v4 = vpop.f32.mrb[10].mxu0 }
 0x22c   : > { %v2512_v16 = vadd.f32 %v4765_v45, %v2473_v53  ;;  %v2474_v50 = vmul.f32 %v4760_v46, %v2414_v29  ;;  %v2498_v51 = vadd.f32 %v4765_v45, %v2459_v22  ;;  %v2460_v24 = vmul.f32 %v3241_v4, %v4760_v46  ;;  %v2350_v54 = vpop.f32.mrb[11].mxu0 }
 0x22d   : > { %v2546_v37 = vmax.f32 %v2514_v6, 0.0  ;;  %v2515_v47 = vadd.f32 %v4765_v45, %v2476_v61  ;;  %v2496_v18 = vadd.f32 %v4765_v45, %v2457_v58  ;;  %v2458_v52 = vmul.f32 %v4760_v46, %v2350_v54 }
 0x22e   : > { %v2544_v12 = vmax.f32 %v2512_v16, 0.0  ;;  %v2513_v5 = vadd.f32 %v4765_v45, %v2474_v50  ;;  %v2530_v35 = vmax.f32 %v2498_v51, 0.0  ;;  %v2499_v28 = vadd.f32 %v4765_v45, %v2460_v24 }
 0x22f   : > { %2578 = vst [vmem:[%s4783_s24 + $0xd0] sm:$0xff] %v2546_v37  ;;  %v2547_v32 = vmax.f32 %v2515_v47, 0.0  ;;  %v2528_v33 = vmax.f32 %v2496_v18, 0.0  ;;  %v2497_v38 = vadd.f32 %v4765_v45, %v2458_v52 }
 0x230   : > { %2576 = vst [vmem:[%s4783_s24 + $0xc0] sm:$0xff] %v2544_v12  ;;  %v2545_v49 = vmax.f32 %v2513_v5, 0.0  ;;  %2562 = vst [vmem:[%s4783_s24 + $0x50] sm:$0xff] %v2530_v35  ;;  %v2531_v25 = vmax.f32 %v2499_v28, 0.0 }
 0x231   : > { %2579 = vst [vmem:[%s4783_s24 + $0xd8] sm:$0xff] %v2547_v32  ;;  %2560 = vst [vmem:[%s4783_s24 + $0x40] sm:$0xff] %v2528_v33  ;;  %v2529_v2 = vmax.f32 %v2497_v38, 0.0 }
 0x232   : > { %2577 = vst [vmem:[%s4783_s24 + $0xc8] sm:$0xff] %v2545_v49  ;;  %2563 = vst [vmem:[%s4783_s24 + $0x58] sm:$0xff] %v2531_v25 }
 0x233   : > { %2561 = vst [vmem:[%s4783_s24 + $0x48] sm:$0xff] %v2529_v2 }
 0x264   : > { %v3260_v56 = vpop.f32.mrb[12].mxu1 }
 0x265   : > { %v2479_v13 = vmul.f32 %v3260_v56, %v4760_v46  ;;  %v2427_v44 = vpop.f32.mrb[13].mxu1  ;;  %v3244_v10 = vpop.f32.mrb[12].mxu0 }
 0x266   : > { %v2477_v60 = vmul.f32 %v4760_v46, %v2427_v44  ;;  %v3261_v0 = vpop.f32.mrb[14].mxu1  ;;  %v2463_v9 = vmul.f32 %v3244_v10, %v4760_v46  ;;  %v2363_v43 = vpop.f32.mrb[13].mxu0 }
 0x267   : > { %v2518_v62 = vadd.f32 %v4765_v45, %v2479_v13  ;;  %v2480_v7 = vmul.f32 %v3261_v0, %v4760_v46  ;;  %v2430_v8 = vpop.f32.mrb[15].mxu1  ;;  %v2461_v11 = vmul.f32 %v4760_v46, %v2363_v43  ;;  %v3245_v14 = vpop.f32.mrb[14].mxu0 }
 0x268   : > { %v2516_v19 = vadd.f32 %v4765_v45, %v2477_v60  ;;  %v2478_v59 = vmul.f32 %v4760_v46, %v2430_v8  ;;  %v2502_v55 = vadd.f32 %v4765_v45, %v2463_v9  ;;  %v2464_v26 = vmul.f32 %v3245_v14, %v4760_v46  ;;  %v2366_v34 = vpop.f32.mrb[15].mxu0 }
 0x269   : > { %v2550_v20 = vmax.f32 %v2518_v62, 0.0  ;;  %v2519_v3 = vadd.f32 %v4765_v45, %v2480_v7  ;;  %v2500_v41 = vadd.f32 %v4765_v45, %v2461_v11  ;;  %v2462_v23 = vmul.f32 %v4760_v46, %v2366_v34 }
 0x26a   : > { %v2548_v27 = vmax.f32 %v2516_v19, 0.0  ;;  %v2517_v57 = vadd.f32 %v4765_v45, %v2478_v59  ;;  %v2534_v63 = vmax.f32 %v2502_v55, 0.0  ;;  %v2503_v15 = vadd.f32 %v4765_v45, %v2464_v26 }
 0x26b   : > { %2582 = vst [vmem:[%s4783_s24 + $0xf0] sm:$0xff] %v2550_v20  ;;  %v2551_v42 = vmax.f32 %v2519_v3, 0.0  ;;  %v2532_v36 = vmax.f32 %v2500_v41, 0.0  ;;  %v2501_v30 = vadd.f32 %v4765_v45, %v2462_v23 }
 0x26c   : > { %2580 = vst [vmem:[%s4783_s24 + $0xe0] sm:$0xff] %v2548_v27  ;;  %v2549_v46 = vmax.f32 %v2517_v57, 0.0  ;;  %2566 = vst [vmem:[%s4783_s24 + $0x70] sm:$0xff] %v2534_v63  ;;  %v2535_v1 = vmax.f32 %v2503_v15, 0.0 }
 0x26d   : > { %2583 = vst [vmem:[%s4783_s24 + $0xf8] sm:$0xff] %v2551_v42  ;;  %2564 = vst [vmem:[%s4783_s24 + $0x60] sm:$0xff] %v2532_v36  ;;  %v2533_v40 = vmax.f32 %v2501_v30, 0.0 }
 0x26e   : > { %2581 = vst [vmem:[%s4783_s24 + $0xe8] sm:$0xff] %v2549_v46  ;;  %2567 = vst [vmem:[%s4783_s24 + $0x78] sm:$0xff] %v2535_v1 }
 0x26f   : > { %2565 = vst [vmem:[%s4783_s24 + $0x68] sm:$0xff] %v2533_v40 }
 0x270   : > { %3609 = shalt.err (!%p3606_p5)
}
 0x271   : > { %s3610_s7 = scalar_lea.hbm %s4868_s5, 4096  ;;  %s3614_s12 = scalar_lea.hbm %s4929_s4, 8192 }
 0x272   : > { %p3611_p6 = scmp.ne.s32.totalorder %s4868_s5, %s3610_s7  ;;  %p3615_p10 = scmp.lt.u32.totalorder %s4868_s5, %s4929_s4 }
 0x273   : > { %p3616_p11 = scmp.lt.u32.totalorder %s3614_s12, %s3610_s7  ;;  %p3618_p13 = scmp.lt.u32.totalorder %s3610_s7, %s4868_s5 }
 0x274   : > { %p3612_p7 = pnand %p3611_p6, %p3751_p4 }
 0x275   : > { %p3617_p12 = por %p3616_p11, %p3615_p10 }
 0x276   : > { %p3613_p9 = pneg %p3612_p7 }
 0x277   : > { %p3619_p0 = por %p3618_p13, %p3617_p12 }
 0x279   : > { %p3620_p1 = pnand %p3619_p0, %p3613_p9 }
 0x27b   : > { %3623 = shalt.err (!%p3620_p1)
}
 0x27c   : > { %s3685_s26 = smov 128  }
 0x27d   : > { %3275 = dma.vmem_to_hbm [thread:$0]  (%p3751_p4), %s4872_s29, 4096, %s4868_s5, %s4878_s6, %s3685_s26, %s3685_s26, %s3676_s8  }
 0x27e PF: > { %p3281_p2 = scmp.ge.s32.totalorder %s3674_s20, 2  ;;  %s2617_s18 = sand.u32 1, %s3654_s15  }
 0x27f   : > { %s2618_s30 = scalar_lea.sflag [#allocation3], %s2617_s18 }
 0x280   : > { %p3278_p3 = pnand %p3281_p2, %p3758_p8 }
 0x282   : > { %3649 = dma.done.wait (!%p3278_p3), %s2618_s30, 4096  }
 0x283   : > { %3651 = vsyncadd (!%p3278_p3), %s2618_s30, 4294963200  ;;  %s17_s20 = sadd.s32 1, %s3674_s20   ;;  %s4932_s15 = smov %s3658_s16 }
 0x284   : > { %p14_p5 = scmp.ge.s32.totalorder %s17_s20, 4   ;;  %s4933_s16 = smov %s3662_s17 }
 0x285   : > { %s4934_s17 = smov %s3764_s28  ;;  %s4935_s18 = smov %s3670_s19 }
 0x286   : > { %s4936_s19 = smov %s4938_s23  ;;  %16 = sbr.rel (!%p14_p5) target bundleno = 4 (0x4), region = 83 }
 0x28d   :  { %2623 = vsyncpa [#allocation3], 1 }
 0x28e   :  { %2625 = vsyncpa [#allocation3 + $0x1], 1 }

</bundles_post_ra>
